<compile_context>
chip_gen: v7x
topology: tpu7x:2x2x1
jax: 0.10.0
libtpu: 0.0.40
codegen_flags: <defaults>
</compile_context>

<pallas_src>
import functools

import jax
import jax.numpy as jnp
from jax.experimental import pallas as pl
from jax.experimental.pallas import tpu as pltpu

# Model hyper-parameters (consistent with the module's __init__).
WINDOW = 8          # window_size
FEA = 4             # fea_num
C_CONV = 64         # Conv2d out_channels
H1 = 128            # lstm1 hidden
H2 = 64             # lstm2 hidden
H_FC1 = 32          # linear1 out
N_OUT = 7           # linear2 out


def _vmem():
    return pl.BlockSpec(memory_space=pltpu.MemorySpace.VMEM)


# ----------------------------------------------------------------------------
# Kernel A: Conv2d(1->64, 3x3, pad=1) as im2col matmul + bias + ReLU, fused
# with MaxPool2d(3x3, stride=1, pad=1).  Pool padding handled with a -inf
# scratch; all ref accesses are static slices (no in-kernel reshape/transpose).
# ----------------------------------------------------------------------------
def conv_pool_kernel(patches_ref, w_ref, b_ref, o_ref, pad_ref):
    bsz, wd, fd, _ = o_ref.shape                      # (B, W, F, 64)

    # conv + ReLU on the MXU: (B*W*F, 9) @ (9, 64)
    y = jnp.dot(patches_ref[...], w_ref[...], preferred_element_type=jnp.float32)
    y = jnp.maximum(y + b_ref[...], 0.0)              # (B*W*F, 64)

    # -inf padded copy for the 3x3 / stride 1 / pad 1 max-pool.
    pad_ref[...] = jnp.full(pad_ref.shape, -jnp.inf, jnp.float32)
    for bi in range(bsz):
        for hi in range(wd):
            r0 = (bi * wd + hi) * fd
            pad_ref[bi, hi + 1, 1:1 + fd, :] = y[r0:r0 + fd, :]

    res = pad_ref[:, 1:1 + wd, 1:1 + fd, :]           # center tap
    for dh in range(3):
        for dw in range(3):
            if dh == 1 and dw == 1:
                continue
            res = jnp.maximum(res, pad_ref[:, dh:dh + wd, dw:dw + fd, :])

    # Dropout2d(0.3): identity in eval mode.
    # TODO(synk): training-mode channel dropout (RNG channel mask) not implemented.
    o_ref[...] = res


def conv_pool(patches, w, b, bsz):
    return pl.pallas_call(
        conv_pool_kernel,
        out_shape=jax.ShapeDtypeStruct((bsz, WINDOW, FEA, C_CONV), jnp.float32),
        in_specs=[_vmem()] * 3,
        out_specs=_vmem(),
        scratch_shapes=[pltpu.VMEM((bsz, WINDOW + 2, FEA + 2, C_CONV), jnp.float32)],
    )(patches, w, b)


# ----------------------------------------------------------------------------
# Kernel B: two stacked LSTMs (fused gate weights, PyTorch gate order i,f,g,o)
# + Linear(64->32) + ReLU + Linear(32->7) epilogue.
# ----------------------------------------------------------------------------
def lstm_head_kernel(x_ref, wih1_ref, whh1_ref, b1_ref,
                     wih2_ref, whh2_ref, b2_ref,
                     fc1w_ref, fc1b_ref, fc2w_ref, fc2b_ref,
                     o_ref, feat_ref, *, seq, nb):
    # Hoisted layer-1 input projection for ALL timesteps: one wide MXU matmul
    # (seq*nb, 256) @ (256, 512), bias folded in.
    xw = jnp.dot(x_ref[...], wih1_ref[...],
                 preferred_element_type=jnp.float32) + b1_ref[...]      # (seq*nb, 4*H1)

    h1 = jnp.zeros((nb, H1), jnp.float32)
    c1 = jnp.zeros((nb, H1), jnp.float32)
    h2 = jnp.zeros((nb, H2), jnp.float32)
    c2 = jnp.zeros((nb, H2), jnp.float32)

    # The recurrence runs over the model batch axis (batch_first=False quirk)
    # and is inherently sequential; seq is tiny (=batch) so a static unroll is fine.
    # TODO(synk): switch to lax.fori_loop with a (h1,c1,h2,c2) carry if seq grows
    # beyond a handful (vreg live-range / compile-time pressure).
    for t in range(seq):
        # Layer 1: only the h @ Whh part stays on the serial chain.
        g1 = xw[t * nb:(t + 1) * nb, :] + jnp.dot(
            h1, whh1_ref[...], preferred_element_type=jnp.float32)       # (nb, 512)
        i1 = jax.nn.sigmoid(g1[:, 0:H1])
        f1 = jax.nn.sigmoid(g1[:, H1:2 * H1])
        gg1 = jnp.tanh(g1[:, 2 * H1:3 * H1])
        o1 = jax.nn.sigmoid(g1[:, 3 * H1:4 * H1])
        c1 = f1 * c1 + i1 * gg1
        h1 = o1 * jnp.tanh(c1)

        # Layer 2: single fused-gate dot per operand (N = 4*H2 = 256, 128-multiple).
        g2 = (jnp.dot(h1, wih2_ref[...], preferred_element_type=jnp.float32)
              + jnp.dot(h2, whh2_ref[...], preferred_element_type=jnp.float32)
              + b2_ref[...])                                              # (nb, 256)
        i2 = jax.nn.sigmoid(g2[:, 0:H2])
        f2 = jax.nn.sigmoid(g2[:, H2:2 * H2])
        gg2 = jnp.tanh(g2[:, 2 * H2:3 * H2])
        o2 = jax.nn.sigmoid(g2[:, 3 * H2:4 * H2])
        c2 = f2 * c2 + i2 * gg2
        h2 = o2 * jnp.tanh(c2)

        # Only row nb-1 is consumed downstream (x[:, -1, :]).
        feat_ref[t:t + 1, :] = h2[nb - 1:nb, :]

    # Head epilogue: features never leave VMEM.
    hmid = jnp.maximum(
        jnp.dot(feat_ref[...], fc1w_ref[...], preferred_element_type=jnp.float32)
        + fc1b_ref[...], 0.0)
    o_ref[...] = jnp.dot(hmid, fc2w_ref[...],
                         preferred_element_type=jnp.float32) + fc2b_ref[...]


def lstm_head(seq_flat, p, *, seq, nb):
    kern = functools.partial(lstm_head_kernel, seq=seq, nb=nb)
    return pl.pallas_call(
        kern,
        out_shape=jax.ShapeDtypeStruct((seq, N_OUT), jnp.float32),
        in_specs=[_vmem()] * 11,
        out_specs=_vmem(),
        scratch_shapes=[pltpu.VMEM((seq, H2), jnp.float32)],
    )(seq_flat, p["wih1"], p["whh1"], p["b1"], p["wih2"], p["whh2"], p["b2"],
      p["fc1_w"], p["fc1_b"], p["fc2_w"], p["fc2_b"])


# ----------------------------------------------------------------------------
# Parameters (deterministic, PyTorch-like uniform init), fused-gate layout.
# ----------------------------------------------------------------------------
def init_params(key):
    ks = jax.random.split(key, 14)

    def u(k, shape, bound):
        return jax.random.uniform(k, shape, jnp.float32, -bound, bound)

    p = {}
    # Conv2d(1, 64, 3): weight (64,1,3,3) -> matmul layout (9, 64), row k = 3*dh+dw.
    p["conv_w"] = u(ks[0], (C_CONV, 3, 3), 1.0 / 3.0).reshape(C_CONV, 9).T
    p["conv_b"] = u(ks[1], (1, C_CONV), 1.0 / 3.0)

    # LSTM1 (256 -> 128): gate columns fused as [i | f | g | o].
    in1 = C_CONV * FEA
    s1 = float(1.0 / (H1 ** 0.5))
    p["wih1"] = u(ks[2], (in1, 4 * H1), s1)
    p["whh1"] = u(ks[3], (H1, 4 * H1), s1)
    p["b1"] = u(ks[4], (1, 4 * H1), s1) + u(ks[5], (1, 4 * H1), s1)     # b_ih + b_hh

    # LSTM2 (128 -> 64)
    s2 = float(1.0 / (H2 ** 0.5))
    p["wih2"] = u(ks[6], (H1, 4 * H2), s2)
    p["whh2"] = u(ks[7], (H2, 4 * H2), s2)
    p["b2"] = u(ks[8], (1, 4 * H2), s2) + u(ks[9], (1, 4 * H2), s2)

    p["fc1_w"] = u(ks[10], (H2, H_FC1), s2)
    p["fc1_b"] = u(ks[11], (1, H_FC1), s2)
    s3 = float(1.0 / (H_FC1 ** 0.5))
    p["fc2_w"] = u(ks[12], (H_FC1, N_OUT), s3)
    p["fc2_b"] = u(ks[13], (1, N_OUT), s3)
    return p


# ----------------------------------------------------------------------------
# Forward glue (only im2col prep + the NCHW raw-reshape permutation live in XLA).
# ----------------------------------------------------------------------------
def cnn_lstm_forward(params, x):
    bsz = x.shape[0]
    # x.reshape([B, 1, window, fea]) — size-1 channel dim carried implicitly.
    img = x.reshape(bsz, WINDOW, FEA).astype(jnp.float32)

    # im2col for the 3x3 / pad=1 conv (zero padding), one tiny fused XLA op.
    xpad = jnp.pad(img, ((0, 0), (1, 1), (1, 1)))
    patches = jnp.stack(
        [xpad[:, dh:dh + WINDOW, dw:dw + FEA] for dh in range(3) for dw in range(3)],
        axis=-1,
    ).reshape(bsz * WINDOW * FEA, 9)

    # Kernel A: conv + ReLU + maxpool fused (channels-last (B, W, F, 64)).
    pooled = conv_pool(patches, params["conv_w"], params["conv_b"], bsz)

    # Reproduce PyTorch's raw NCHW-contiguous reshape to (B, W, 64*F), flattened
    # to (B*W, 256) matmul rows (seq-major, matching batch_first=False).
    seq_flat = jnp.transpose(pooled, (0, 3, 1, 2)).reshape(bsz * WINDOW, C_CONV * FEA)

    # Kernel B: stacked LSTMs + head, output (B, 7).
    return lstm_head(seq_flat, params, seq=bsz, nb=WINDOW)


# ----------------------------------------------------------------------------
# Pure-JAX reference (same math, no Pallas) for a sanity check.
# ----------------------------------------------------------------------------
def reference_forward(p, x):
    bsz = x.shape[0]
    img = x.reshape(bsz, WINDOW, FEA).astype(jnp.float32)
    xpad = jnp.pad(img, ((0, 0), (1, 1), (1, 1)))
    patches = jnp.stack(
        [xpad[:, dh:dh + WINDOW, dw:dw + FEA] for dh in range(3) for dw in range(3)],
        axis=-1,
    ).reshape(bsz * WINDOW * FEA, 9)
    y = jnp.maximum(patches @ p["conv_w"] + p["conv_b"], 0.0)
    y = y.reshape(bsz, WINDOW, FEA, C_CONV)
    ypad = jnp.pad(y, ((0, 0), (1, 1), (1, 1), (0, 0)), constant_values=-jnp.inf)
    z = ypad[:, 1:1 + WINDOW, 1:1 + FEA, :]
    for dh in range(3):
        for dw in range(3):
            z = jnp.maximum(z, ypad[:, dh:dh + WINDOW, dw:dw + FEA, :])
    seq_x = jnp.transpose(z, (0, 3, 1, 2)).reshape(bsz, WINDOW, C_CONV * FEA)

    def cell(xt, h, c, wih, whh, bb, hid):
        g = xt @ wih + h @ whh + bb
        i = jax.nn.sigmoid(g[:, 0:hid])
        f = jax.nn.sigmoid(g[:, hid:2 * hid])
        gg = jnp.tanh(g[:, 2 * hid:3 * hid])
        o = jax.nn.sigmoid(g[:, 3 * hid:4 * hid])
        c = f * c + i * gg
        return o * jnp.tanh(c), c

    h1 = jnp.zeros((WINDOW, H1)); c1 = jnp.zeros((WINDOW, H1))
    h2 = jnp.zeros((WINDOW, H2)); c2 = jnp.zeros((WINDOW, H2))
    feats = []
    for t in range(bsz):
        h1, c1 = cell(seq_x[t], h1, c1, p["wih1"], p["whh1"], p["b1"], H1)
        h2, c2 = cell(h1, h2, c2, p["wih2"], p["whh2"], p["b2"], H2)
        feats.append(h2[WINDOW - 1])
    feat = jnp.stack(feats, axis=0)                                      # (B, 64)
    hmid = jnp.maximum(feat @ p["fc1_w"] + p["fc1_b"], 0.0)
    return hmid @ p["fc2_w"] + p["fc2_b"]


if __name__ == "__main__":
    key = jax.random.PRNGKey(0)
    pkey, xkey = jax.random.split(key)
    params = init_params(pkey)

    # batch=2, window_size=8, fea_num=4
    x = jax.random.normal(xkey, (2, WINDOW, FEA), jnp.float32)

    out = jax.jit(functools.partial(cnn_lstm_forward, params))(x)
    out = jax.block_until_ready(out)
    assert out.shape == (2, N_OUT), out.shape

    ref = reference_forward(params, x)
    assert bool(jnp.allclose(out, ref, rtol=2e-2, atol=2e-2)), (out, ref)

    print("KERNEL_OK")
</pallas_src>

<mosaic_0001>
module attributes {stable_mosaic.version = 11 : i64} {
  func.func @conv_pool_kernel(%arg0: memref<64x9xf32, #tpu.memory_space<vmem>>, %arg1: memref<9x64xf32, #tpu.memory_space<vmem>>, %arg2: memref<1x64xf32, #tpu.memory_space<vmem>>, %arg3: memref<2x8x4x64xf32, #tpu.memory_space<vmem>>, %arg4: memref<2x10x6x64xf32, #tpu.memory_space<vmem>>) attributes {dimension_semantics = [], scalar_prefetch = 0 : i64, scratch_operands = 1 : i64, tpu.core_type = #tpu.core_type<tc>} {
    %c0 = arith.constant 0 : index
    %c0_0 = arith.constant 0 : index
    %0 = vector.load %arg0[%c0, %c0_0] : memref<64x9xf32, #tpu.memory_space<vmem>>, vector<64x9xf32>
    %c0_1 = arith.constant 0 : index
    %c0_2 = arith.constant 0 : index
    %1 = vector.load %arg1[%c0_1, %c0_2] : memref<9x64xf32, #tpu.memory_space<vmem>>, vector<9x64xf32>
    %cst = arith.constant dense<0.000000e+00> : vector<64x64xf32>
    %2 = tpu.matmul %0, %1, %cst {dimension_numbers = #tpu.dot_dimension_numbers<[1], [0], [0], [1], [0, 0, 1, 1], [], []>} : vector<64x9xf32>, vector<9x64xf32>, vector<64x64xf32> -> vector<64x64xf32>
    %c0_3 = arith.constant 0 : index
    %c0_4 = arith.constant 0 : index
    %3 = vector.load %arg2[%c0_3, %c0_4] : memref<1x64xf32, #tpu.memory_space<vmem>>, vector<1x64xf32>
    %4 = vector.broadcast %3 : vector<1x64xf32> to vector<64x64xf32>
    %5 = arith.addf %2, %4 : vector<64x64xf32>
    %cst_5 = arith.constant 0.000000e+00 : f32
    %6 = vector.broadcast %cst_5 : f32 to vector<64x64xf32>
    %7 = arith.maximumf %5, %6 : vector<64x64xf32>
    %cst_6 = arith.constant 0xFF800000 : f32
    %8 = vector.broadcast %cst_6 : f32 to vector<2x10x6x64xf32>
    %c0_7 = arith.constant 0 : index
    %c0_8 = arith.constant 0 : index
    %c0_9 = arith.constant 0 : index
    %c0_10 = arith.constant 0 : index
    %9 = vector.load %arg4[%c0_7, %c0_8, %c0_9, %c0_10] : memref<2x10x6x64xf32, #tpu.memory_space<vmem>>, vector<2x10x6x64xf32>
    tpu.vector_store %arg4[%c0_7, %c0_8, %c0_9, %c0_10], %8 {strides = array<i32>} : memref<2x10x6x64xf32, #tpu.memory_space<vmem>>, vector<2x10x6x64xf32>,
    %10 = vector.extract_strided_slice %7 {offsets = [0, 0], sizes = [4, 64], strides = [1, 1]} : vector<64x64xf32> to vector<4x64xf32>
    %c0_11 = arith.constant 0 : index
    %c1 = arith.constant 1 : index
    %c1_12 = arith.constant 1 : index
    %c0_13 = arith.constant 0 : index
    %11 = vector.load %arg4[%c0_11, %c1, %c1_12, %c0_13] : memref<2x10x6x64xf32, #tpu.memory_space<vmem>>, vector<1x1x4x64xf32>
    %12 = vector.shape_cast %11 : vector<1x1x4x64xf32> to vector<4x64xf32>
    %13 = vector.shape_cast %10 : vector<4x64xf32> to vector<1x1x4x64xf32>
    tpu.vector_store %arg4[%c0_11, %c1, %c1_12, %c0_13], %13 {strides = array<i32>} : memref<2x10x6x64xf32, #tpu.memory_space<vmem>>, vector<1x1x4x64xf32>,
    %14 = vector.extract_strided_slice %7 {offsets = [4, 0], sizes = [4, 64], strides = [1, 1]} : vector<64x64xf32> to vector<4x64xf32>
    %c0_14 = arith.constant 0 : index
    %c2 = arith.constant 2 : index
    %c1_15 = arith.constant 1 : index
    %c0_16 = arith.constant 0 : index
    %15 = vector.load %arg4[%c0_14, %c2, %c1_15, %c0_16] : memref<2x10x6x64xf32, #tpu.memory_space<vmem>>, vector<1x1x4x64xf32>
    %16 = vector.shape_cast %15 : vector<1x1x4x64xf32> to vector<4x64xf32>
    %17 = vector.shape_cast %14 : vector<4x64xf32> to vector<1x1x4x64xf32>
    tpu.vector_store %arg4[%c0_14, %c2, %c1_15, %c0_16], %17 {strides = array<i32>} : memref<2x10x6x64xf32, #tpu.memory_space<vmem>>, vector<1x1x4x64xf32>,
    %18 = vector.extract_strided_slice %7 {offsets = [8, 0], sizes = [4, 64], strides = [1, 1]} : vector<64x64xf32> to vector<4x64xf32>
    %c0_17 = arith.constant 0 : index
    %c3 = arith.constant 3 : index
    %c1_18 = arith.constant 1 : index
    %c0_19 = arith.constant 0 : index
    %19 = vector.load %arg4[%c0_17, %c3, %c1_18, %c0_19] : memref<2x10x6x64xf32, #tpu.memory_space<vmem>>, vector<1x1x4x64xf32>
    %20 = vector.shape_cast %19 : vector<1x1x4x64xf32> to vector<4x64xf32>
    %21 = vector.shape_cast %18 : vector<4x64xf32> to vector<1x1x4x64xf32>
    tpu.vector_store %arg4[%c0_17, %c3, %c1_18, %c0_19], %21 {strides = array<i32>} : memref<2x10x6x64xf32, #tpu.memory_space<vmem>>, vector<1x1x4x64xf32>,
    %22 = vector.extract_strided_slice %7 {offsets = [12, 0], sizes = [4, 64], strides = [1, 1]} : vector<64x64xf32> to vector<4x64xf32>
    %c0_20 = arith.constant 0 : index
    %c4 = arith.constant 4 : index
    %c1_21 = arith.constant 1 : index
    %c0_22 = arith.constant 0 : index
    %23 = vector.load %arg4[%c0_20, %c4, %c1_21, %c0_22] : memref<2x10x6x64xf32, #tpu.memory_space<vmem>>, vector<1x1x4x64xf32>
    %24 = vector.shape_cast %23 : vector<1x1x4x64xf32> to vector<4x64xf32>
    %25 = vector.shape_cast %22 : vector<4x64xf32> to vector<1x1x4x64xf32>
    tpu.vector_store %arg4[%c0_20, %c4, %c1_21, %c0_22], %25 {strides = array<i32>} : memref<2x10x6x64xf32, #tpu.memory_space<vmem>>, vector<1x1x4x64xf32>,
    %26 = vector.extract_strided_slice %7 {offsets = [16, 0], sizes = [4, 64], strides = [1, 1]} : vector<64x64xf32> to vector<4x64xf32>
    %c0_23 = arith.constant 0 : index
    %c5 = arith.constant 5 : index
    %c1_24 = arith.constant 1 : index
    %c0_25 = arith.constant 0 : index
    %27 = vector.load %arg4[%c0_23, %c5, %c1_24, %c0_25] : memref<2x10x6x64xf32, #tpu.memory_space<vmem>>, vector<1x1x4x64xf32>
    %28 = vector.shape_cast %27 : vector<1x1x4x64xf32> to vector<4x64xf32>
    %29 = vector.shape_cast %26 : vector<4x64xf32> to vector<1x1x4x64xf32>
    tpu.vector_store %arg4[%c0_23, %c5, %c1_24, %c0_25], %29 {strides = array<i32>} : memref<2x10x6x64xf32, #tpu.memory_space<vmem>>, vector<1x1x4x64xf32>,
    %30 = vector.extract_strided_slice %7 {offsets = [20, 0], sizes = [4, 64], strides = [1, 1]} : vector<64x64xf32> to vector<4x64xf32>
    %c0_26 = arith.constant 0 : index
    %c6 = arith.constant 6 : index
    %c1_27 = arith.constant 1 : index
    %c0_28 = arith.constant 0 : index
    %31 = vector.load %arg4[%c0_26, %c6, %c1_27, %c0_28] : memref<2x10x6x64xf32, #tpu.memory_space<vmem>>, vector<1x1x4x64xf32>
    %32 = vector.shape_cast %31 : vector<1x1x4x64xf32> to vector<4x64xf32>
    %33 = vector.shape_cast %30 : vector<4x64xf32> to vector<1x1x4x64xf32>
    tpu.vector_store %arg4[%c0_26, %c6, %c1_27, %c0_28], %33 {strides = array<i32>} : memref<2x10x6x64xf32, #tpu.memory_space<vmem>>, vector<1x1x4x64xf32>,
    %34 = vector.extract_strided_slice %7 {offsets = [24, 0], sizes = [4, 64], strides = [1, 1]} : vector<64x64xf32> to vector<4x64xf32>
    %c0_29 = arith.constant 0 : index
    %c7 = arith.constant 7 : index
    %c1_30 = arith.constant 1 : index
    %c0_31 = arith.constant 0 : index
    %35 = vector.load %arg4[%c0_29, %c7, %c1_30, %c0_31] : memref<2x10x6x64xf32, #tpu.memory_space<vmem>>, vector<1x1x4x64xf32>
    %36 = vector.shape_cast %35 : vector<1x1x4x64xf32> to vector<4x64xf32>
    %37 = vector.shape_cast %34 : vector<4x64xf32> to vector<1x1x4x64xf32>
    tpu.vector_store %arg4[%c0_29, %c7, %c1_30, %c0_31], %37 {strides = array<i32>} : memref<2x10x6x64xf32, #tpu.memory_space<vmem>>, vector<1x1x4x64xf32>,
    %38 = vector.extract_strided_slice %7 {offsets = [28, 0], sizes = [4, 64], strides = [1, 1]} : vector<64x64xf32> to vector<4x64xf32>
    %c0_32 = arith.constant 0 : index
    %c8 = arith.constant 8 : index
    %c1_33 = arith.constant 1 : index
    %c0_34 = arith.constant 0 : index
    %39 = vector.load %arg4[%c0_32, %c8, %c1_33, %c0_34] : memref<2x10x6x64xf32, #tpu.memory_space<vmem>>, vector<1x1x4x64xf32>
    %40 = vector.shape_cast %39 : vector<1x1x4x64xf32> to vector<4x64xf32>
    %41 = vector.shape_cast %38 : vector<4x64xf32> to vector<1x1x4x64xf32>
    tpu.vector_store %arg4[%c0_32, %c8, %c1_33, %c0_34], %41 {strides = array<i32>} : memref<2x10x6x64xf32, #tpu.memory_space<vmem>>, vector<1x1x4x64xf32>,
    %42 = vector.extract_strided_slice %7 {offsets = [32, 0], sizes = [4, 64], strides = [1, 1]} : vector<64x64xf32> to vector<4x64xf32>
    %c1_35 = arith.constant 1 : index
    %c1_36 = arith.constant 1 : index
    %c1_37 = arith.constant 1 : index
    %c0_38 = arith.constant 0 : index
    %43 = vector.load %arg4[%c1_35, %c1_36, %c1_37, %c0_38] : memref<2x10x6x64xf32, #tpu.memory_space<vmem>>, vector<1x1x4x64xf32>
    %44 = vector.shape_cast %43 : vector<1x1x4x64xf32> to vector<4x64xf32>
    %45 = vector.shape_cast %42 : vector<4x64xf32> to vector<1x1x4x64xf32>
    tpu.vector_store %arg4[%c1_35, %c1_36, %c1_37, %c0_38], %45 {strides = array<i32>} : memref<2x10x6x64xf32, #tpu.memory_space<vmem>>, vector<1x1x4x64xf32>,
    %46 = vector.extract_strided_slice %7 {offsets = [36, 0], sizes = [4, 64], strides = [1, 1]} : vector<64x64xf32> to vector<4x64xf32>
    %c1_39 = arith.constant 1 : index
    %c2_40 = arith.constant 2 : index
    %c1_41 = arith.constant 1 : index
    %c0_42 = arith.constant 0 : index
    %47 = vector.load %arg4[%c1_39, %c2_40, %c1_41, %c0_42] : memref<2x10x6x64xf32, #tpu.memory_space<vmem>>, vector<1x1x4x64xf32>
    %48 = vector.shape_cast %47 : vector<1x1x4x64xf32> to vector<4x64xf32>
    %49 = vector.shape_cast %46 : vector<4x64xf32> to vector<1x1x4x64xf32>
    tpu.vector_store %arg4[%c1_39, %c2_40, %c1_41, %c0_42], %49 {strides = array<i32>} : memref<2x10x6x64xf32, #tpu.memory_space<vmem>>, vector<1x1x4x64xf32>,
    %50 = vector.extract_strided_slice %7 {offsets = [40, 0], sizes = [4, 64], strides = [1, 1]} : vector<64x64xf32> to vector<4x64xf32>
    %c1_43 = arith.constant 1 : index
    %c3_44 = arith.constant 3 : index
    %c1_45 = arith.constant 1 : index
    %c0_46 = arith.constant 0 : index
    %51 = vector.load %arg4[%c1_43, %c3_44, %c1_45, %c0_46] : memref<2x10x6x64xf32, #tpu.memory_space<vmem>>, vector<1x1x4x64xf32>
    %52 = vector.shape_cast %51 : vector<1x1x4x64xf32> to vector<4x64xf32>
    %53 = vector.shape_cast %50 : vector<4x64xf32> to vector<1x1x4x64xf32>
    tpu.vector_store %arg4[%c1_43, %c3_44, %c1_45, %c0_46], %53 {strides = array<i32>} : memref<2x10x6x64xf32, #tpu.memory_space<vmem>>, vector<1x1x4x64xf32>,
    %54 = vector.extract_strided_slice %7 {offsets = [44, 0], sizes = [4, 64], strides = [1, 1]} : vector<64x64xf32> to vector<4x64xf32>
    %c1_47 = arith.constant 1 : index
    %c4_48 = arith.constant 4 : index
    %c1_49 = arith.constant 1 : index
    %c0_50 = arith.constant 0 : index
    %55 = vector.load %arg4[%c1_47, %c4_48, %c1_49, %c0_50] : memref<2x10x6x64xf32, #tpu.memory_space<vmem>>, vector<1x1x4x64xf32>
    %56 = vector.shape_cast %55 : vector<1x1x4x64xf32> to vector<4x64xf32>
    %57 = vector.shape_cast %54 : vector<4x64xf32> to vector<1x1x4x64xf32>
    tpu.vector_store %arg4[%c1_47, %c4_48, %c1_49, %c0_50], %57 {strides = array<i32>} : memref<2x10x6x64xf32, #tpu.memory_space<vmem>>, vector<1x1x4x64xf32>,
    %58 = vector.extract_strided_slice %7 {offsets = [48, 0], sizes = [4, 64], strides = [1, 1]} : vector<64x64xf32> to vector<4x64xf32>
    %c1_51 = arith.constant 1 : index
    %c5_52 = arith.constant 5 : index
    %c1_53 = arith.constant 1 : index
    %c0_54 = arith.constant 0 : index
    %59 = vector.load %arg4[%c1_51, %c5_52, %c1_53, %c0_54] : memref<2x10x6x64xf32, #tpu.memory_space<vmem>>, vector<1x1x4x64xf32>
    %60 = vector.shape_cast %59 : vector<1x1x4x64xf32> to vector<4x64xf32>
    %61 = vector.shape_cast %58 : vector<4x64xf32> to vector<1x1x4x64xf32>
    tpu.vector_store %arg4[%c1_51, %c5_52, %c1_53, %c0_54], %61 {strides = array<i32>} : memref<2x10x6x64xf32, #tpu.memory_space<vmem>>, vector<1x1x4x64xf32>,
    %62 = vector.extract_strided_slice %7 {offsets = [52, 0], sizes = [4, 64], strides = [1, 1]} : vector<64x64xf32> to vector<4x64xf32>
    %c1_55 = arith.constant 1 : index
    %c6_56 = arith.constant 6 : index
    %c1_57 = arith.constant 1 : index
    %c0_58 = arith.constant 0 : index
    %63 = vector.load %arg4[%c1_55, %c6_56, %c1_57, %c0_58] : memref<2x10x6x64xf32, #tpu.memory_space<vmem>>, vector<1x1x4x64xf32>
    %64 = vector.shape_cast %63 : vector<1x1x4x64xf32> to vector<4x64xf32>
    %65 = vector.shape_cast %62 : vector<4x64xf32> to vector<1x1x4x64xf32>
    tpu.vector_store %arg4[%c1_55, %c6_56, %c1_57, %c0_58], %65 {strides = array<i32>} : memref<2x10x6x64xf32, #tpu.memory_space<vmem>>, vector<1x1x4x64xf32>,
    %66 = vector.extract_strided_slice %7 {offsets = [56, 0], sizes = [4, 64], strides = [1, 1]} : vector<64x64xf32> to vector<4x64xf32>
    %c1_59 = arith.constant 1 : index
    %c7_60 = arith.constant 7 : index
    %c1_61 = arith.constant 1 : index
    %c0_62 = arith.constant 0 : index
    %67 = vector.load %arg4[%c1_59, %c7_60, %c1_61, %c0_62] : memref<2x10x6x64xf32, #tpu.memory_space<vmem>>, vector<1x1x4x64xf32>
    %68 = vector.shape_cast %67 : vector<1x1x4x64xf32> to vector<4x64xf32>
    %69 = vector.shape_cast %66 : vector<4x64xf32> to vector<1x1x4x64xf32>
    tpu.vector_store %arg4[%c1_59, %c7_60, %c1_61, %c0_62], %69 {strides = array<i32>} : memref<2x10x6x64xf32, #tpu.memory_space<vmem>>, vector<1x1x4x64xf32>,
    %70 = vector.extract_strided_slice %7 {offsets = [60, 0], sizes = [4, 64], strides = [1, 1]} : vector<64x64xf32> to vector<4x64xf32>
    %c1_63 = arith.constant 1 : index
    %c8_64 = arith.constant 8 : index
    %c1_65 = arith.constant 1 : index
    %c0_66 = arith.constant 0 : index
    %71 = vector.load %arg4[%c1_63, %c8_64, %c1_65, %c0_66] : memref<2x10x6x64xf32, #tpu.memory_space<vmem>>, vector<1x1x4x64xf32>
    %72 = vector.shape_cast %71 : vector<1x1x4x64xf32> to vector<4x64xf32>
    %73 = vector.shape_cast %70 : vector<4x64xf32> to vector<1x1x4x64xf32>
    tpu.vector_store %arg4[%c1_63, %c8_64, %c1_65, %c0_66], %73 {strides = array<i32>} : memref<2x10x6x64xf32, #tpu.memory_space<vmem>>, vector<1x1x4x64xf32>,
    %c0_67 = arith.constant 0 : index
    %c1_68 = arith.constant 1 : index
    %c1_69 = arith.constant 1 : index
    %c0_70 = arith.constant 0 : index
    %74 = vector.load %arg4[%c0_67, %c1_68, %c1_69, %c0_70] : memref<2x10x6x64xf32, #tpu.memory_space<vmem>>, vector<2x8x4x64xf32>
    %c0_71 = arith.constant 0 : index
    %c0_72 = arith.constant 0 : index
    %c0_73 = arith.constant 0 : index
    %c0_74 = arith.constant 0 : index
    %75 = vector.load %arg4[%c0_71, %c0_72, %c0_73, %c0_74] : memref<2x10x6x64xf32, #tpu.memory_space<vmem>>, vector<2x8x4x64xf32>
    %76 = arith.maximumf %74, %75 : vector<2x8x4x64xf32>
    %c0_75 = arith.constant 0 : index
    %c0_76 = arith.constant 0 : index
    %c1_77 = arith.constant 1 : index
    %c0_78 = arith.constant 0 : index
    %77 = vector.load %arg4[%c0_75, %c0_76, %c1_77, %c0_78] : memref<2x10x6x64xf32, #tpu.memory_space<vmem>>, vector<2x8x4x64xf32>
    %78 = arith.maximumf %76, %77 : vector<2x8x4x64xf32>
    %c0_79 = arith.constant 0 : index
    %c0_80 = arith.constant 0 : index
    %c2_81 = arith.constant 2 : index
    %c0_82 = arith.constant 0 : index
    %79 = vector.load %arg4[%c0_79, %c0_80, %c2_81, %c0_82] : memref<2x10x6x64xf32, #tpu.memory_space<vmem>>, vector<2x8x4x64xf32>
    %80 = arith.maximumf %78, %79 : vector<2x8x4x64xf32>
    %c0_83 = arith.constant 0 : index
    %c1_84 = arith.constant 1 : index
    %c0_85 = arith.constant 0 : index
    %c0_86 = arith.constant 0 : index
    %81 = vector.load %arg4[%c0_83, %c1_84, %c0_85, %c0_86] : memref<2x10x6x64xf32, #tpu.memory_space<vmem>>, vector<2x8x4x64xf32>
    %82 = arith.maximumf %80, %81 : vector<2x8x4x64xf32>
    %c0_87 = arith.constant 0 : index
    %c1_88 = arith.constant 1 : index
    %c2_89 = arith.constant 2 : index
    %c0_90 = arith.constant 0 : index
    %83 = vector.load %arg4[%c0_87, %c1_88, %c2_89, %c0_90] : memref<2x10x6x64xf32, #tpu.memory_space<vmem>>, vector<2x8x4x64xf32>
    %84 = arith.maximumf %82, %83 : vector<2x8x4x64xf32>
    %c0_91 = arith.constant 0 : index
    %c2_92 = arith.constant 2 : index
    %c0_93 = arith.constant 0 : index
    %c0_94 = arith.constant 0 : index
    %85 = vector.load %arg4[%c0_91, %c2_92, %c0_93, %c0_94] : memref<2x10x6x64xf32, #tpu.memory_space<vmem>>, vector<2x8x4x64xf32>
    %86 = arith.maximumf %84, %85 : vector<2x8x4x64xf32>
    %c0_95 = arith.constant 0 : index
    %c2_96 = arith.constant 2 : index
    %c1_97 = arith.constant 1 : index
    %c0_98 = arith.constant 0 : index
    %87 = vector.load %arg4[%c0_95, %c2_96, %c1_97, %c0_98] : memref<2x10x6x64xf32, #tpu.memory_space<vmem>>, vector<2x8x4x64xf32>
    %88 = arith.maximumf %86, %87 : vector<2x8x4x64xf32>
    %c0_99 = arith.constant 0 : index
    %c2_100 = arith.constant 2 : index
    %c2_101 = arith.constant 2 : index
    %c0_102 = arith.constant 0 : index
    %89 = vector.load %arg4[%c0_99, %c2_100, %c2_101, %c0_102] : memref<2x10x6x64xf32, #tpu.memory_space<vmem>>, vector<2x8x4x64xf32>
    %90 = arith.maximumf %88, %89 : vector<2x8x4x64xf32>
    %c0_103 = arith.constant 0 : index
    %c0_104 = arith.constant 0 : index
    %c0_105 = arith.constant 0 : index
    %c0_106 = arith.constant 0 : index
    %91 = vector.load %arg3[%c0_103, %c0_104, %c0_105, %c0_106] : memref<2x8x4x64xf32, #tpu.memory_space<vmem>>, vector<2x8x4x64xf32>
    tpu.vector_store %arg3[%c0_103, %c0_104, %c0_105, %c0_106], %90 {strides = array<i32>} : memref<2x8x4x64xf32, #tpu.memory_space<vmem>>, vector<2x8x4x64xf32>,
    return
  }
}

module attributes {stable_mosaic.version = 11 : i64} {
  func.func @lstm_head_kernel(%arg0: memref<16x256xf32, #tpu.memory_space<vmem>>, %arg1: memref<256x512xf32, #tpu.memory_space<vmem>>, %arg2: memref<128x512xf32, #tpu.memory_space<vmem>>, %arg3: memref<1x512xf32, #tpu.memory_space<vmem>>, %arg4: memref<128x256xf32, #tpu.memory_space<vmem>>, %arg5: memref<64x256xf32, #tpu.memory_space<vmem>>, %arg6: memref<1x256xf32, #tpu.memory_space<vmem>>, %arg7: memref<64x32xf32, #tpu.memory_space<vmem>>, %arg8: memref<1x32xf32, #tpu.memory_space<vmem>>, %arg9: memref<32x7xf32, #tpu.memory_space<vmem>>, %arg10: memref<1x7xf32, #tpu.memory_space<vmem>>, %arg11: memref<2x7xf32, #tpu.memory_space<vmem>>, %arg12: memref<2x64xf32, #tpu.memory_space<vmem>>) attributes {dimension_semantics = [], scalar_prefetch = 0 : i64, scratch_operands = 1 : i64, tpu.core_type = #tpu.core_type<tc>} {
    %c0 = arith.constant 0 : index
    %c0_0 = arith.constant 0 : index
    %0 = vector.load %arg0[%c0, %c0_0] : memref<16x256xf32, #tpu.memory_space<vmem>>, vector<16x256xf32>
    %c0_1 = arith.constant 0 : index
    %c0_2 = arith.constant 0 : index
    %1 = vector.load %arg1[%c0_1, %c0_2] : memref<256x512xf32, #tpu.memory_space<vmem>>, vector<256x512xf32>
    %cst = arith.constant dense<0.000000e+00> : vector<16x512xf32>
    %2 = tpu.matmul %0, %1, %cst {dimension_numbers = #tpu.dot_dimension_numbers<[1], [0], [0], [1], [0, 0, 1, 1], [], []>} : vector<16x256xf32>, vector<256x512xf32>, vector<16x512xf32> -> vector<16x512xf32>
    %c0_3 = arith.constant 0 : index
    %c0_4 = arith.constant 0 : index
    %3 = vector.load %arg3[%c0_3, %c0_4] : memref<1x512xf32, #tpu.memory_space<vmem>>, vector<1x512xf32>
    %4 = vector.broadcast %3 : vector<1x512xf32> to vector<16x512xf32>
    %5 = arith.addf %2, %4 : vector<16x512xf32>
    %cst_5 = arith.constant 0.000000e+00 : f32
    %6 = vector.broadcast %cst_5 : f32 to vector<8x128xf32>
    %cst_6 = arith.constant 0.000000e+00 : f32
    %7 = vector.broadcast %cst_6 : f32 to vector<8x128xf32>
    %cst_7 = arith.constant 0.000000e+00 : f32
    %8 = vector.broadcast %cst_7 : f32 to vector<8x64xf32>
    %cst_8 = arith.constant 0.000000e+00 : f32
    %9 = vector.broadcast %cst_8 : f32 to vector<8x64xf32>
    %10 = vector.extract_strided_slice %5 {offsets = [0, 0], sizes = [8, 512], strides = [1, 1]} : vector<16x512xf32> to vector<8x512xf32>
    %c0_9 = arith.constant 0 : index
    %c0_10 = arith.constant 0 : index
    %11 = vector.load %arg2[%c0_9, %c0_10] : memref<128x512xf32, #tpu.memory_space<vmem>>, vector<128x512xf32>
    %cst_11 = arith.constant dense<0.000000e+00> : vector<8x512xf32>
    %12 = tpu.matmul %6, %11, %cst_11 {dimension_numbers = #tpu.dot_dimension_numbers<[1], [0], [0], [1], [0, 0, 1, 1], [], []>} : vector<8x128xf32>, vector<128x512xf32>, vector<8x512xf32> -> vector<8x512xf32>
    %13 = arith.addf %10, %12 : vector<8x512xf32>
    %14 = vector.extract_strided_slice %13 {offsets = [0, 0], sizes = [8, 128], strides = [1, 1]} : vector<8x512xf32> to vector<8x128xf32>
    %15 = arith.negf %14 : vector<8x128xf32>
    %16 = math.exp %15 : vector<8x128xf32>
    %cst_12 = arith.constant 1.000000e+00 : f32
    %17 = vector.broadcast %cst_12 : f32 to vector<8x128xf32>
    %18 = arith.addf %17, %16 : vector<8x128xf32>
    %19 = arith.divf %17, %18 : vector<8x128xf32>
    %20 = vector.extract_strided_slice %13 {offsets = [0, 128], sizes = [8, 128], strides = [1, 1]} : vector<8x512xf32> to vector<8x128xf32>
    %21 = arith.negf %20 : vector<8x128xf32>
    %22 = math.exp %21 : vector<8x128xf32>
    %cst_13 = arith.constant 1.000000e+00 : f32
    %23 = vector.broadcast %cst_13 : f32 to vector<8x128xf32>
    %24 = arith.addf %23, %22 : vector<8x128xf32>
    %25 = arith.divf %23, %24 : vector<8x128xf32>
    %26 = vector.extract_strided_slice %13 {offsets = [0, 256], sizes = [8, 128], strides = [1, 1]} : vector<8x512xf32> to vector<8x128xf32>
    %27 = math.tanh %26 : vector<8x128xf32>
    %28 = vector.extract_strided_slice %13 {offsets = [0, 384], sizes = [8, 128], strides = [1, 1]} : vector<8x512xf32> to vector<8x128xf32>
    %29 = arith.negf %28 : vector<8x128xf32>
    %30 = math.exp %29 : vector<8x128xf32>
    %cst_14 = arith.constant 1.000000e+00 : f32
    %31 = vector.broadcast %cst_14 : f32 to vector<8x128xf32>
    %32 = arith.addf %31, %30 : vector<8x128xf32>
    %33 = arith.divf %31, %32 : vector<8x128xf32>
    %34 = arith.mulf %25, %7 : vector<8x128xf32>
    %35 = arith.mulf %19, %27 : vector<8x128xf32>
    %36 = arith.addf %34, %35 : vector<8x128xf32>
    %37 = math.tanh %36 : vector<8x128xf32>
    %38 = arith.mulf %33, %37 : vector<8x128xf32>
    %c0_15 = arith.constant 0 : index
    %c0_16 = arith.constant 0 : index
    %39 = vector.load %arg4[%c0_15, %c0_16] : memref<128x256xf32, #tpu.memory_space<vmem>>, vector<128x256xf32>
    %cst_17 = arith.constant dense<0.000000e+00> : vector<8x256xf32>
    %40 = tpu.matmul %38, %39, %cst_17 {dimension_numbers = #tpu.dot_dimension_numbers<[1], [0], [0], [1], [0, 0, 1, 1], [], []>} : vector<8x128xf32>, vector<128x256xf32>, vector<8x256xf32> -> vector<8x256xf32>
    %c0_18 = arith.constant 0 : index
    %c0_19 = arith.constant 0 : index
    %41 = vector.load %arg5[%c0_18, %c0_19] : memref<64x256xf32, #tpu.memory_space<vmem>>, vector<64x256xf32>
    %cst_20 = arith.constant dense<0.000000e+00> : vector<8x256xf32>
    %42 = tpu.matmul %8, %41, %cst_20 {dimension_numbers = #tpu.dot_dimension_numbers<[1], [0], [0], [1], [0, 0, 1, 1], [], []>} : vector<8x64xf32>, vector<64x256xf32>, vector<8x256xf32> -> vector<8x256xf32>
    %43 = arith.addf %40, %42 : vector<8x256xf32>
    %c0_21 = arith.constant 0 : index
    %c0_22 = arith.constant 0 : index
    %44 = vector.load %arg6[%c0_21, %c0_22] : memref<1x256xf32, #tpu.memory_space<vmem>>, vector<1x256xf32>
    %45 = vector.broadcast %44 : vector<1x256xf32> to vector<8x256xf32>
    %46 = arith.addf %43, %45 : vector<8x256xf32>
    %47 = vector.extract_strided_slice %46 {offsets = [0, 0], sizes = [8, 64], strides = [1, 1]} : vector<8x256xf32> to vector<8x64xf32>
    %48 = arith.negf %47 : vector<8x64xf32>
    %49 = math.exp %48 : vector<8x64xf32>
    %cst_23 = arith.constant 1.000000e+00 : f32
    %50 = vector.broadcast %cst_23 : f32 to vector<8x64xf32>
    %51 = arith.addf %50, %49 : vector<8x64xf32>
    %52 = arith.divf %50, %51 : vector<8x64xf32>
    %53 = vector.extract_strided_slice %46 {offsets = [0, 64], sizes = [8, 64], strides = [1, 1]} : vector<8x256xf32> to vector<8x64xf32>
    %54 = arith.negf %53 : vector<8x64xf32>
    %55 = math.exp %54 : vector<8x64xf32>
    %cst_24 = arith.constant 1.000000e+00 : f32
    %56 = vector.broadcast %cst_24 : f32 to vector<8x64xf32>
    %57 = arith.addf %56, %55 : vector<8x64xf32>
    %58 = arith.divf %56, %57 : vector<8x64xf32>
    %59 = vector.extract_strided_slice %46 {offsets = [0, 128], sizes = [8, 64], strides = [1, 1]} : vector<8x256xf32> to vector<8x64xf32>
    %60 = math.tanh %59 : vector<8x64xf32>
    %61 = vector.extract_strided_slice %46 {offsets = [0, 192], sizes = [8, 64], strides = [1, 1]} : vector<8x256xf32> to vector<8x64xf32>
    %62 = arith.negf %61 : vector<8x64xf32>
    %63 = math.exp %62 : vector<8x64xf32>
    %cst_25 = arith.constant 1.000000e+00 : f32
    %64 = vector.broadcast %cst_25 : f32 to vector<8x64xf32>
    %65 = arith.addf %64, %63 : vector<8x64xf32>
    %66 = arith.divf %64, %65 : vector<8x64xf32>
    %67 = arith.mulf %58, %9 : vector<8x64xf32>
    %68 = arith.mulf %52, %60 : vector<8x64xf32>
    %69 = arith.addf %67, %68 : vector<8x64xf32>
    %70 = math.tanh %69 : vector<8x64xf32>
    %71 = arith.mulf %66, %70 : vector<8x64xf32>
    %72 = vector.extract_strided_slice %71 {offsets = [7, 0], sizes = [1, 64], strides = [1, 1]} : vector<8x64xf32> to vector<1x64xf32>
    %c0_26 = arith.constant 0 : index
    %c0_27 = arith.constant 0 : index
    %73 = vector.load %arg12[%c0_26, %c0_27] : memref<2x64xf32, #tpu.memory_space<vmem>>, vector<1x64xf32>
    tpu.vector_store %arg12[%c0_26, %c0_27], %72 {strides = array<i32>} : memref<2x64xf32, #tpu.memory_space<vmem>>, vector<1x64xf32>,
    %74 = vector.extract_strided_slice %5 {offsets = [8, 0], sizes = [8, 512], strides = [1, 1]} : vector<16x512xf32> to vector<8x512xf32>
    %c0_28 = arith.constant 0 : index
    %c0_29 = arith.constant 0 : index
    %75 = vector.load %arg2[%c0_28, %c0_29] : memref<128x512xf32, #tpu.memory_space<vmem>>, vector<128x512xf32>
    %cst_30 = arith.constant dense<0.000000e+00> : vector<8x512xf32>
    %76 = tpu.matmul %38, %75, %cst_30 {dimension_numbers = #tpu.dot_dimension_numbers<[1], [0], [0], [1], [0, 0, 1, 1], [], []>} : vector<8x128xf32>, vector<128x512xf32>, vector<8x512xf32> -> vector<8x512xf32>
    %77 = arith.addf %74, %76 : vector<8x512xf32>
    %78 = vector.extract_strided_slice %77 {offsets = [0, 0], sizes = [8, 128], strides = [1, 1]} : vector<8x512xf32> to vector<8x128xf32>
    %79 = arith.negf %78 : vector<8x128xf32>
    %80 = math.exp %79 : vector<8x128xf32>
    %cst_31 = arith.constant 1.000000e+00 : f32
    %81 = vector.broadcast %cst_31 : f32 to vector<8x128xf32>
    %82 = arith.addf %81, %80 : vector<8x128xf32>
    %83 = arith.divf %81, %82 : vector<8x128xf32>
    %84 = vector.extract_strided_slice %77 {offsets = [0, 128], sizes = [8, 128], strides = [1, 1]} : vector<8x512xf32> to vector<8x128xf32>
    %85 = arith.negf %84 : vector<8x128xf32>
    %86 = math.exp %85 : vector<8x128xf32>
    %cst_32 = arith.constant 1.000000e+00 : f32
    %87 = vector.broadcast %cst_32 : f32 to vector<8x128xf32>
    %88 = arith.addf %87, %86 : vector<8x128xf32>
    %89 = arith.divf %87, %88 : vector<8x128xf32>
    %90 = vector.extract_strided_slice %77 {offsets = [0, 256], sizes = [8, 128], strides = [1, 1]} : vector<8x512xf32> to vector<8x128xf32>
    %91 = math.tanh %90 : vector<8x128xf32>
    %92 = vector.extract_strided_slice %77 {offsets = [0, 384], sizes = [8, 128], strides = [1, 1]} : vector<8x512xf32> to vector<8x128xf32>
    %93 = arith.negf %92 : vector<8x128xf32>
    %94 = math.exp %93 : vector<8x128xf32>
    %cst_33 = arith.constant 1.000000e+00 : f32
    %95 = vector.broadcast %cst_33 : f32 to vector<8x128xf32>
    %96 = arith.addf %95, %94 : vector<8x128xf32>
    %97 = arith.divf %95, %96 : vector<8x128xf32>
    %98 = arith.mulf %89, %36 : vector<8x128xf32>
    %99 = arith.mulf %83, %91 : vector<8x128xf32>
    %100 = arith.addf %98, %99 : vector<8x128xf32>
    %101 = math.tanh %100 : vector<8x128xf32>
    %102 = arith.mulf %97, %101 : vector<8x128xf32>
    %c0_34 = arith.constant 0 : index
    %c0_35 = arith.constant 0 : index
    %103 = vector.load %arg4[%c0_34, %c0_35] : memref<128x256xf32, #tpu.memory_space<vmem>>, vector<128x256xf32>
    %cst_36 = arith.constant dense<0.000000e+00> : vector<8x256xf32>
    %104 = tpu.matmul %102, %103, %cst_36 {dimension_numbers = #tpu.dot_dimension_numbers<[1], [0], [0], [1], [0, 0, 1, 1], [], []>} : vector<8x128xf32>, vector<128x256xf32>, vector<8x256xf32> -> vector<8x256xf32>
    %c0_37 = arith.constant 0 : index
    %c0_38 = arith.constant 0 : index
    %105 = vector.load %arg5[%c0_37, %c0_38] : memref<64x256xf32, #tpu.memory_space<vmem>>, vector<64x256xf32>
    %cst_39 = arith.constant dense<0.000000e+00> : vector<8x256xf32>
    %106 = tpu.matmul %71, %105, %cst_39 {dimension_numbers = #tpu.dot_dimension_numbers<[1], [0], [0], [1], [0, 0, 1, 1], [], []>} : vector<8x64xf32>, vector<64x256xf32>, vector<8x256xf32> -> vector<8x256xf32>
    %107 = arith.addf %104, %106 : vector<8x256xf32>
    %c0_40 = arith.constant 0 : index
    %c0_41 = arith.constant 0 : index
    %108 = vector.load %arg6[%c0_40, %c0_41] : memref<1x256xf32, #tpu.memory_space<vmem>>, vector<1x256xf32>
    %109 = vector.broadcast %108 : vector<1x256xf32> to vector<8x256xf32>
    %110 = arith.addf %107, %109 : vector<8x256xf32>
    %111 = vector.extract_strided_slice %110 {offsets = [0, 0], sizes = [8, 64], strides = [1, 1]} : vector<8x256xf32> to vector<8x64xf32>
    %112 = arith.negf %111 : vector<8x64xf32>
    %113 = math.exp %112 : vector<8x64xf32>
    %cst_42 = arith.constant 1.000000e+00 : f32
    %114 = vector.broadcast %cst_42 : f32 to vector<8x64xf32>
    %115 = arith.addf %114, %113 : vector<8x64xf32>
    %116 = arith.divf %114, %115 : vector<8x64xf32>
    %117 = vector.extract_strided_slice %110 {offsets = [0, 64], sizes = [8, 64], strides = [1, 1]} : vector<8x256xf32> to vector<8x64xf32>
    %118 = arith.negf %117 : vector<8x64xf32>
    %119 = math.exp %118 : vector<8x64xf32>
    %cst_43 = arith.constant 1.000000e+00 : f32
    %120 = vector.broadcast %cst_43 : f32 to vector<8x64xf32>
    %121 = arith.addf %120, %119 : vector<8x64xf32>
    %122 = arith.divf %120, %121 : vector<8x64xf32>
    %123 = vector.extract_strided_slice %110 {offsets = [0, 128], sizes = [8, 64], strides = [1, 1]} : vector<8x256xf32> to vector<8x64xf32>
    %124 = math.tanh %123 : vector<8x64xf32>
    %125 = vector.extract_strided_slice %110 {offsets = [0, 192], sizes = [8, 64], strides = [1, 1]} : vector<8x256xf32> to vector<8x64xf32>
    %126 = arith.negf %125 : vector<8x64xf32>
    %127 = math.exp %126 : vector<8x64xf32>
    %cst_44 = arith.constant 1.000000e+00 : f32
    %128 = vector.broadcast %cst_44 : f32 to vector<8x64xf32>
    %129 = arith.addf %128, %127 : vector<8x64xf32>
    %130 = arith.divf %128, %129 : vector<8x64xf32>
    %131 = arith.mulf %122, %69 : vector<8x64xf32>
    %132 = arith.mulf %116, %124 : vector<8x64xf32>
    %133 = arith.addf %131, %132 : vector<8x64xf32>
    %134 = math.tanh %133 : vector<8x64xf32>
    %135 = arith.mulf %130, %134 : vector<8x64xf32>
    %136 = vector.extract_strided_slice %135 {offsets = [7, 0], sizes = [1, 64], strides = [1, 1]} : vector<8x64xf32> to vector<1x64xf32>
    %c1 = arith.constant 1 : index
    %c0_45 = arith.constant 0 : index
    %137 = vector.load %arg12[%c1, %c0_45] : memref<2x64xf32, #tpu.memory_space<vmem>>, vector<1x64xf32>
    tpu.vector_store %arg12[%c1, %c0_45], %136 {strides = array<i32>} : memref<2x64xf32, #tpu.memory_space<vmem>>, vector<1x64xf32>,
    %c0_46 = arith.constant 0 : index
    %c0_47 = arith.constant 0 : index
    %138 = vector.load %arg12[%c0_46, %c0_47] : memref<2x64xf32, #tpu.memory_space<vmem>>, vector<2x64xf32>
    %c0_48 = arith.constant 0 : index
    %c0_49 = arith.constant 0 : index
    %139 = vector.load %arg7[%c0_48, %c0_49] : memref<64x32xf32, #tpu.memory_space<vmem>>, vector<64x32xf32>
    %cst_50 = arith.constant dense<0.000000e+00> : vector<2x32xf32>
    %140 = tpu.matmul %138, %139, %cst_50 {dimension_numbers = #tpu.dot_dimension_numbers<[1], [0], [0], [1], [0, 0, 1, 1], [], []>} : vector<2x64xf32>, vector<64x32xf32>, vector<2x32xf32> -> vector<2x32xf32>
    %c0_51 = arith.constant 0 : index
    %c0_52 = arith.constant 0 : index
    %141 = vector.load %arg8[%c0_51, %c0_52] : memref<1x32xf32, #tpu.memory_space<vmem>>, vector<1x32xf32>
    %142 = vector.broadcast %141 : vector<1x32xf32> to vector<2x32xf32>
    %143 = arith.addf %140, %142 : vector<2x32xf32>
    %cst_53 = arith.constant 0.000000e+00 : f32
    %144 = vector.broadcast %cst_53 : f32 to vector<2x32xf32>
    %145 = arith.maximumf %143, %144 : vector<2x32xf32>
    %c0_54 = arith.constant 0 : index
    %c0_55 = arith.constant 0 : index
    %146 = vector.load %arg9[%c0_54, %c0_55] : memref<32x7xf32, #tpu.memory_space<vmem>>, vector<32x7xf32>
    %cst_56 = arith.constant dense<0.000000e+00> : vector<2x7xf32>
    %147 = tpu.matmul %145, %146, %cst_56 {dimension_numbers = #tpu.dot_dimension_numbers<[1], [0], [0], [1], [0, 0, 1, 1], [], []>} : vector<2x32xf32>, vector<32x7xf32>, vector<2x7xf32> -> vector<2x7xf32>
    %c0_57 = arith.constant 0 : index
    %c0_58 = arith.constant 0 : index
    %148 = vector.load %arg10[%c0_57, %c0_58] : memref<1x7xf32, #tpu.memory_space<vmem>>, vector<1x7xf32>
    %149 = vector.broadcast %148 : vector<1x7xf32> to vector<2x7xf32>
    %150 = arith.addf %147, %149 : vector<2x7xf32>
    %c0_59 = arith.constant 0 : index
    %c0_60 = arith.constant 0 : index
    %151 = vector.load %arg11[%c0_59, %c0_60] : memref<2x7xf32, #tpu.memory_space<vmem>>, vector<2x7xf32>
    tpu.vector_store %arg11[%c0_59, %c0_60], %150 {strides = array<i32>} : memref<2x7xf32, #tpu.memory_space<vmem>>, vector<2x7xf32>,
    return
  }
}

</mosaic_0001>

<bundles_post_ra>
// kernel: cnn_lstm_forward.2
= control target key start
LH: loop header
LB: loop body
LE: loop exit
PB: predicated region body
PF: predicated region fallthrough
CT: control target
= control target key end

     0   :  { %vm56_vm0 = vcmask 1040384   ;;  %vm31_vm1 = vcmask 72704   ;;  %vm566_vm2 = vmmov 1   ;;  %vm173_vm4 = vcmask 521216   ;;  %s744_s1 = inlined_call_operand.vmem [shape: f32[9,64], index: 1, kind: input, shape index: {}]   ;;  %s745_s0 = inlined_call_operand.vmem [shape: f32[64,9], index: 0, kind: input, shape index: {}]   ;;  %s746_s2 = inlined_call_operand.vmem [shape: f32[1,64], index: 2, kind: input, shape index: {}]   ;;  %s747_s3 = inlined_call_operand.vmem [shape: f32[2,8,4,64], index: 3, kind: output, shape index: {}]  }
   0x1   :  { %v22_v0 = vld [vmem:[%s744_s1] sm:$0xff]  ;;  %v23_v1 = vld [vmem:[%s744_s1 + $0x8] sm:$0x1]  ;;  %vm557_vm3 = vmpackc.low %vm56_vm0, %vm566_vm2  ;;  %v567_v11 = vmov -inf   ;;  %vm195_vm5 = vcmask 519168   ;;  %vm198_vm6 = vcmask 523268  }
   0x2   :  { %v556_v2 = vpack.c.bf16 %v23_v1, %v22_v0  ;;  %v14_v3 = vld [vmem:[%s745_s0] sm:$0xff]  ;;  %v15_v5 = vld [vmem:[%s745_s0 + $0x8] sm:$0xff]  ;;  %v16_v7 = vld [vmem:[%s745_s0 + $0x10] sm:$0xff]  ;;  %177 = vst.msk [vmem:[#allocation2 + $0x18] sm:$0x3f] %vm173_vm4, %v567_v11 }
   0x3   :  { %v18_v4 = vld [vmem:[%s745_s0 + $0x20] sm:$0xff]  ;;  %544 = vmatprep.mubr.msk.f32.mxu0 %vm31_vm1, %v14_v3  ;;  %v19_v6 = vld [vmem:[%s745_s0 + $0x28] sm:$0xff]  ;;  %v20_v8 = vld [vmem:[%s745_s0 + $0x30] sm:$0xff]  ;;  %178 = vst.msk [vmem:[#allocation2 + $0x20] sm:$0x3f] %vm173_vm4, %v567_v11 }
   0x4   :  { %550 = vmatprep.mubr.msk.f32.mxu1 %vm31_vm1, %v18_v4  ;;  %558 = vmatprep.subr.msk.bf16.mxu0 %vm557_vm3, %v556_v2  ;;  %v17_v9 = vld [vmem:[%s745_s0 + $0x18] sm:$0xff]  ;;  %174 = vst.msk [vmem:[#allocation2] sm:$0x3f] %vm173_vm4, %v567_v11  ;;  %175 = vst.msk [vmem:[#allocation2 + $0x8] sm:$0x3f] %vm173_vm4, %v567_v11 }
   0x5   :  { %562 = vmatprep.subr.msk.bf16.mxu1 %vm557_vm3, %v556_v2  ;;  %561 = vmatpush3.bf16.msk.msra.mxu0 %vm557_vm3, %v556_v2  ;;  %v21_v10 = vld [vmem:[%s745_s0 + $0x38] sm:$0xff]  ;;  %176 = vst.msk [vmem:[#allocation2 + $0x10] sm:$0x3f] %vm173_vm4, %v567_v11  ;;  %179 = vst.msk [vmem:[#allocation2 + $0x28] sm:$0x3f] %vm173_vm4, %v567_v11 }
   0x6   :  { %563 = vmatpush3.bf16.msk.msra.mxu1 %vm557_vm3, %v556_v2  ;;  %180 = vst.msk [vmem:[#allocation2 + $0x30] sm:$0x3f] %vm173_vm4, %v567_v11  ;;  %181 = vst.msk [vmem:[#allocation2 + $0x38] sm:$0x3f] %vm173_vm4, %v567_v11  ;;  %v520_v12 = vld [vmem:[%s746_s2] ss:$0 sm:$0xff] }
   0x7   :  { %182 = vst.msk [vmem:[#allocation2 + $0x40] sm:$0x3f] %vm173_vm4, %v567_v11  ;;  %183 = vst.msk [vmem:[#allocation2 + $0x48] sm:$0x3f] %vm173_vm4, %v567_v11 }
   0x8   :  { %545 = vmatmul.mubr.msk.f32.vlgmr.msra.gmra.mrb[0].mxu0 %vm31_vm1, %v15_v5  ;;  %184 = vst.msk [vmem:[#allocation2 + $0x50] sm:$0x3f] %vm173_vm4, %v567_v11  ;;  %185 = vst.msk [vmem:[#allocation2 + $0x58] sm:$0x3f] %vm173_vm4, %v567_v11 }
   0x9   :  { %551 = vmatmul.mubr.msk.f32.vlgmr.msra.gmra.mrb[0].mxu1 %vm31_vm1, %v19_v6  ;;  %547 = vmatprep.mubr.msk.f32.mxu0 %vm31_vm1, %v16_v7  ;;  %186 = vst.msk [vmem:[#allocation2 + $0x60] sm:$0x3f] %vm173_vm4, %v567_v11  ;;  %187 = vst.msk [vmem:[#allocation2 + $0x68] sm:$0x3f] %vm173_vm4, %v567_v11 }
   0xa   :  { %553 = vmatprep.mubr.msk.f32.mxu1 %vm31_vm1, %v20_v8  ;;  %188 = vst.msk [vmem:[#allocation2 + $0x70] sm:$0x3f] %vm173_vm4, %v567_v11  ;;  %189 = vst.msk [vmem:[#allocation2 + $0x78] sm:$0x3f] %vm173_vm4, %v567_v11 }
   0xb   :  { %190 = vst.msk [vmem:[#allocation2 + $0x80] sm:$0x3f] %vm173_vm4, %v567_v11  ;;  %191 = vst.msk [vmem:[#allocation2 + $0x88] sm:$0x3f] %vm173_vm4, %v567_v11  ;;  %v244_v39 = vld [vmem:[#allocation2] sm:$0xf] }
   0xc   :  { %548 = vmatmul.mubr.msk.f32.gmra.mrb[2].mxu0 %vm31_vm1, %v17_v9  ;;  %192 = vst.msk [vmem:[#allocation2 + $0x90] sm:$0x3f] %vm173_vm4, %v567_v11  ;;  %193 = vst.msk [vmem:[#allocation2 + $0x98] sm:$0x3f] %vm173_vm4, %v567_v11  ;;  %v276_v41 = vld [vmem:[#allocation2 + $0x1] sm:$0xf] }
   0xd   :  { %554 = vmatmul.mubr.msk.f32.gmra.mrb[2].mxu1 %vm31_vm1, %v21_v10  ;;  %v308_v51 = vld [vmem:[#allocation2 + $0x2] sm:$0xf] }
   0xf   :  { %v252_v52 = vld [vmem:[#allocation2 + $0x50] sm:$0xf] }
  0x10   :  { %v284_v57 = vld [vmem:[#allocation2 + $0x51] sm:$0xf] }
  0x11   :  { %v316_v6 = vld [vmem:[#allocation2 + $0x52] sm:$0xf] }
  0xdb   :  { %v546_v13 = vpop.f32.mrb[0].mxu0 }
  0xdc   :  { %v552_v14 = vpop.f32.mrb[0].mxu1  ;;  %v132_v15 = vadd.f32 %v546_v13, %v520_v12  ;;  %v126_v17 = vpop.f32.mrb[1].mxu0 }
  0xdd   :  { %v152_v16 = vadd.f32 %v552_v14, %v520_v12  ;;  %v146_v18 = vpop.f32.mrb[1].mxu1  ;;  %v127_v19 = vadd.f32 %v520_v12, %v126_v17 }
  0xde   :  { %v147_v20 = vadd.f32 %v520_v12, %v146_v18  ;;  %v166_v21 = vmax.f32 %v132_v15, 0.0 }
  0xdf   :  { %v170_v22 = vmax.f32 %v152_v16, 0.0  ;;  %v165_v23 = vmax.f32 %v127_v19, 0.0  ;;  %v549_v25 = vpop.f32.mrb[2].mxu0 }
  0xe0   :  { %v169_v24 = vmax.f32 %v147_v20, 0.0  ;;  %v555_v26 = vpop.f32.mrb[2].mxu1  ;;  %201 = vst.msk [vmem:[#allocation2 + $0x19] sm:$0xf] %vm195_vm5, %v166_v21  ;;  %v142_v27 = vadd.f32 %v549_v25, %v520_v12  ;;  %v136_v29 = vpop.f32.mrb[3].mxu0 }
  0xe1   :  { %203 = vst.msk [vmem:[#allocation2 + $0x1d] sm:$0xf0] %vm198_vm6, %v166_v21  ;;  %219 = vst.msk [vmem:[#allocation2 + $0x6d] sm:$0xf0] %vm198_vm6, %v170_v22  ;;  %v162_v28 = vadd.f32 %v555_v26, %v520_v12  ;;  %v156_v30 = vpop.f32.mrb[3].mxu1  ;;  %v137_v31 = vadd.f32 %v520_v12, %v136_v29 }
  0xe2   :  { %217 = vst.msk [vmem:[#allocation2 + $0x69] sm:$0xf] %vm195_vm5, %v170_v22  ;;  %196 = vst.msk [vmem:[#allocation2 + $0x9] sm:$0xf] %vm195_vm5, %v165_v23  ;;  %v157_v32 = vadd.f32 %v520_v12, %v156_v30  ;;  %v168_v33 = vmax.f32 %v142_v27, 0.0 }
  0xe3   :  { %199 = vst.msk [vmem:[#allocation2 + $0xd] sm:$0xf0] %vm198_vm6, %v165_v23  ;;  %215 = vst.msk [vmem:[#allocation2 + $0x5d] sm:$0xf0] %vm198_vm6, %v169_v24  ;;  %v172_v34 = vmax.f32 %v162_v28, 0.0  ;;  %v167_v35 = vmax.f32 %v137_v31, 0.0 }
  0xe4   :  { %213 = vst.msk [vmem:[#allocation2 + $0x59] sm:$0xf] %vm195_vm5, %v169_v24  ;;  %v171_v36 = vmax.f32 %v157_v32, 0.0  ;;  %209 = vst.msk [vmem:[#allocation2 + $0x39] sm:$0xf] %vm195_vm5, %v168_v33 }
  0xe5   :  { %211 = vst.msk [vmem:[#allocation2 + $0x3d] sm:$0xf0] %vm198_vm6, %v168_v33  ;;  %227 = vst.msk [vmem:[#allocation2 + $0x8d] sm:$0xf0] %vm198_vm6, %v172_v34 }
  0xe6   :  { %225 = vst.msk [vmem:[#allocation2 + $0x89] sm:$0xf] %vm195_vm5, %v172_v34  ;;  %205 = vst.msk [vmem:[#allocation2 + $0x29] sm:$0xf] %vm195_vm5, %v167_v35 }
  0xe7   :  { %207 = vst.msk [vmem:[#allocation2 + $0x2d] sm:$0xf0] %vm198_vm6, %v167_v35  ;;  %223 = vst.msk [vmem:[#allocation2 + $0x7d] sm:$0xf0] %vm198_vm6, %v171_v36  ;;  %v247_v38 = vld [vmem:[#allocation2 + $0x18] sm:$0xf] }
  0xe8   :  { %221 = vst.msk [vmem:[#allocation2 + $0x79] sm:$0xf] %vm195_vm5, %v171_v36  ;;  %v231_v37 = vld [vmem:[#allocation2 + $0x21] sm:$0xf]  ;;  %v230_v40 = vld [vmem:[#allocation2 + $0x19] sm:$0xf] }
  0xe9   :  { %v263_v42 = vmax.f32 %v231_v37, %v247_v38  ;;  %v228_v43 = vld [vmem:[#allocation2 + $0x9] sm:$0xf]  ;;  %v279_v53 = vld [vmem:[#allocation2 + $0x19] sm:$0xf]  ;;  %v239_v14 = vld [vmem:[#allocation2 + $0x71] sm:$0xf] }
  0xea   :  { %v229_v44 = vld [vmem:[#allocation2 + $0x11] sm:$0xf]  ;;  %v245_v45 = vld [vmem:[#allocation2 + $0x8] sm:$0xf]  ;;  %v260_v47 = vmax.f32 %v228_v43, %v244_v39  ;;  %v311_v63 = vld [vmem:[#allocation2 + $0x1a] sm:$0xf] }
  0xeb   :  { %v246_v46 = vld [vmem:[#allocation2 + $0x10] sm:$0xf]  ;;  %v261_v48 = vmax.f32 %v229_v44, %v245_v45  ;;  %v277_v50 = vld [vmem:[#allocation2 + $0x9] sm:$0xf]  ;;  %v295_v58 = vmax.f32 %v263_v42, %v279_v53  ;;  %v342_v0 = vld [vmem:[#allocation2 + $0x18] sm:$0xf] }
  0xec   :  { %v262_v49 = vmax.f32 %v230_v40, %v246_v46  ;;  %v278_v54 = vld [vmem:[#allocation2 + $0x11] sm:$0xf]  ;;  %v292_v55 = vmax.f32 %v260_v47, %v276_v41  ;;  %v238_v59 = vld [vmem:[#allocation2 + $0x69] sm:$0xf]  ;;  %v236_v3 = vld [vmem:[#allocation2 + $0x59] sm:$0xf] }
  0xed   :  { %v293_v56 = vmax.f32 %v261_v48, %v277_v50  ;;  %v309_v61 = vld [vmem:[#allocation2 + $0xa] sm:$0xf]  ;;  %v310_v62 = vld [vmem:[#allocation2 + $0x12] sm:$0xf]  ;;  %v237_v4 = vld [vmem:[#allocation2 + $0x61] sm:$0xf]  ;;  %v268_v11 = vmax.f32 %v236_v3, %v252_v52  ;;  %v327_v20 = vmax.f32 %v295_v58, %v311_v63 }
  0xee   :  { %v294_v60 = vmax.f32 %v262_v49, %v278_v54  ;;  %v324_v1 = vmax.f32 %v292_v55, %v308_v51  ;;  %v253_v5 = vld [vmem:[#allocation2 + $0x58] sm:$0xf]  ;;  %v340_v8 = vld [vmem:[#allocation2 + $0x8] sm:$0xf]  ;;  %v341_v9 = vld [vmem:[#allocation2 + $0x10] sm:$0xf] }
  0xef   :  { %v325_v2 = vmax.f32 %v293_v56, %v309_v61  ;;  %v254_v10 = vld [vmem:[#allocation2 + $0x60] sm:$0xf]  ;;  %v269_v12 = vmax.f32 %v237_v4, %v253_v5  ;;  %v374_v13 = vld [vmem:[#allocation2 + $0x1a] sm:$0xf]  ;;  %v255_v15 = vld [vmem:[#allocation2 + $0x68] sm:$0xf]  ;;  %v300_v26 = vmax.f32 %v268_v11, %v284_v57 }
  0xf0   :  { %v326_v7 = vmax.f32 %v294_v60, %v310_v62  ;;  %v356_v16 = vmax.f32 %v324_v1, %v340_v8  ;;  %v270_v18 = vmax.f32 %v238_v59, %v254_v10  ;;  %v285_v19 = vld [vmem:[#allocation2 + $0x59] sm:$0xf]  ;;  %v372_v23 = vld [vmem:[#allocation2 + $0xa] sm:$0xf]  ;;  %v373_v24 = vld [vmem:[#allocation2 + $0x12] sm:$0xf]  ;;  %v271_v36 = vmax.f32 %v239_v14, %v255_v15 }
  0xf1   :  { %v357_v17 = vmax.f32 %v325_v2, %v341_v9  ;;  %v405_v21 = vld [vmem:[#allocation2 + $0x18] sm:$0xf]  ;;  %v286_v25 = vld [vmem:[#allocation2 + $0x61] sm:$0xf]  ;;  %v301_v27 = vmax.f32 %v269_v12, %v285_v19  ;;  %v404_v32 = vld [vmem:[#allocation2 + $0x10] sm:$0xf]  ;;  %v332_v39 = vmax.f32 %v300_v26, %v316_v6 }
  0xf2   :  { %v358_v22 = vmax.f32 %v326_v7, %v342_v0  ;;  %v343_v28 = vld [vmem:[#allocation2 + $0x20] sm:$0xf]  ;;  %v388_v30 = vmax.f32 %v356_v16, %v372_v23  ;;  %v302_v33 = vmax.f32 %v270_v18, %v286_v25  ;;  %v317_v34 = vld [vmem:[#allocation2 + $0x5a] sm:$0xf]  ;;  %v287_v44 = vld [vmem:[#allocation2 + $0x69] sm:$0xf] }
  0xf3   :  { %v406_v29 = vld [vmem:[#allocation2 + $0x20] sm:$0xf]  ;;  %v389_v31 = vmax.f32 %v357_v17, %v373_v24  ;;  %v437_v35 = vld [vmem:[#allocation2 + $0x19] sm:$0xf]  ;;  %v333_v40 = vmax.f32 %v301_v27, %v317_v34  ;;  %v665_v51 = vmax.f32 %v327_v20, %v343_v28  ;;  %v350_v53 = vld [vmem:[#allocation2 + $0x68] sm:$0xf]  ;;  %v667_v3 = vmax.f32 %v271_v36, %v287_v44 }
  0xf4   :  { %v390_v37 = vmax.f32 %v358_v22, %v374_v13  ;;  %v318_v38 = vld [vmem:[#allocation2 + $0x62] sm:$0xf]  ;;  %v251_v42 = vld [vmem:[#allocation2 + $0x38] sm:$0xf]  ;;  %v420_v45 = vmax.f32 %v388_v30, %v404_v32  ;;  %v436_v55 = vld [vmem:[#allocation2 + $0x11] sm:$0xf] }
  0xf5   :  { %v235_v41 = vld [vmem:[#allocation2 + $0x41] sm:$0xf]  ;;  %v421_v46 = vmax.f32 %v389_v31, %v405_v21  ;;  %v334_v47 = vmax.f32 %v302_v33, %v318_v38  ;;  %v348_v48 = vld [vmem:[#allocation2 + $0x58] sm:$0xf]  ;;  %v382_v60 = vld [vmem:[#allocation2 + $0x6a] sm:$0xf] }
  0xf6   :  { %v438_v43 = vld [vmem:[#allocation2 + $0x21] sm:$0xf]  ;;  %v267_v50 = vmax.f32 %v235_v41, %v251_v42  ;;  %v469_v52 = vld [vmem:[#allocation2 + $0x1a] sm:$0xf]  ;;  %v422_v54 = vmax.f32 %v390_v37, %v406_v29  ;;  %v364_v56 = vmax.f32 %v332_v39, %v348_v48  ;;  %v452_v61 = vmax.f32 %v420_v45, %v436_v55  ;;  %v413_v4 = vld [vmem:[#allocation2 + $0x68] sm:$0xf] }
  0xf7   :  { %v349_v49 = vld [vmem:[#allocation2 + $0x60] sm:$0xf]  ;;  %v283_v58 = vld [vmem:[#allocation2 + $0x39] sm:$0xf]  ;;  %v453_v62 = vmax.f32 %v421_v46, %v437_v35  ;;  %v366_v63 = vmax.f32 %v334_v47, %v350_v53  ;;  %v468_v6 = vld [vmem:[#allocation2 + $0x12] sm:$0xf] }
  0xf8   :  { %v365_v57 = vmax.f32 %v333_v40, %v349_v49  ;;  %v470_v59 = vld [vmem:[#allocation2 + $0x22] sm:$0xf]  ;;  %v380_v0 = vld [vmem:[#allocation2 + $0x5a] sm:$0xf]  ;;  %v299_v2 = vmax.f32 %v267_v50, %v283_v58  ;;  %v454_v5 = vmax.f32 %v422_v54, %v438_v43  ;;  %v319_v10 = vld [vmem:[#allocation2 + $0x6a] sm:$0xf]  ;;  %v484_v11 = vmax.f32 %v452_v61, %v468_v6 }
  0xf9   :  { %v381_v1 = vld [vmem:[#allocation2 + $0x62] sm:$0xf]  ;;  %v396_v7 = vmax.f32 %v364_v56, %v380_v0  ;;  %v315_v9 = vld [vmem:[#allocation2 + $0x3a] sm:$0xf]  ;;  %v485_v12 = vmax.f32 %v453_v62, %v469_v52  ;;  %v398_v13 = vmax.f32 %v366_v63, %v382_v60  ;;  %v243_v16 = vld [vmem:[#allocation2 + $0x91] sm:$0xf]  ;;  %v335_v33 = vmax.f32 %v667_v3, %v319_v10 }
  0xfa   :  { %v397_v8 = vmax.f32 %v365_v57, %v381_v1  ;;  %v412_v14 = vld [vmem:[#allocation2 + $0x60] sm:$0xf]  ;;  %v331_v15 = vmax.f32 %v299_v2, %v315_v9  ;;  %v259_v17 = vld [vmem:[#allocation2 + $0x88] sm:$0xf]  ;;  %v414_v18 = vld [vmem:[#allocation2 + $0x70] sm:$0xf]  ;;  %v486_v20 = vmax.f32 %v454_v5, %v470_v59 }
  0xfb   :  { %v445_v19 = vld [vmem:[#allocation2 + $0x69] sm:$0xf]  ;;  %v428_v21 = vmax.f32 %v396_v7, %v412_v14  ;;  %v347_v23 = vld [vmem:[#allocation2 + $0x40] sm:$0xf]  ;;  %v275_v25 = vmax.f32 %v243_v16, %v259_v17  ;;  %v446_v27 = vld [vmem:[#allocation2 + $0x71] sm:$0xf]  ;;  %v430_v28 = vmax.f32 %v398_v13, %v414_v18 }
  0xfc   :  { %v429_v22 = vmax.f32 %v397_v8, %v413_v4  ;;  %v411_v24 = vld [vmem:[#allocation2 + $0x48] sm:$0xf]  ;;  %v669_v26 = vld [vmem:[#allocation2 + $0x22] sm:$0xf]  ;;  %500 = vst.msk [vmem:[%s747_s3] sm:$0xf] %vm195_vm5, %v484_v11  ;;  %v363_v30 = vmax.f32 %v331_v15, %v347_v23 }
  0xfd   :  { %501 = vst.msk [vmem:[%s747_s3 + $0x4] sm:$0xf] %vm195_vm5, %v485_v12  ;;  %v444_v29 = vld [vmem:[#allocation2 + $0x61] sm:$0xf]  ;;  %v291_v31 = vld [vmem:[#allocation2 + $0x89] sm:$0xf]  ;;  %v462_v41 = vmax.f32 %v430_v28, %v446_v27  ;;  %v391_v46 = vmax.f32 %v665_v51, %v669_v26 }
  0xfe   :  { %v248_v32 = vld [vmem:[#allocation2 + $0x20] sm:$0xf]  ;;  %v477_v34 = vld [vmem:[#allocation2 + $0x6a] sm:$0xf]  ;;  %v478_v35 = vld [vmem:[#allocation2 + $0x72] sm:$0xf]  ;;  %v460_v36 = vmax.f32 %v428_v21, %v444_v29  ;;  %v461_v37 = vmax.f32 %v429_v22, %v445_v19  ;;  %v307_v40 = vmax.f32 %v275_v25, %v291_v31 }
  0xff   :  { %502 = vst.msk [vmem:[%s747_s3 + $0x8] sm:$0xf] %vm195_vm5, %v486_v20  ;;  %v379_v38 = vld [vmem:[#allocation2 + $0x42] sm:$0xf]  ;;  %v443_v39 = vld [vmem:[#allocation2 + $0x49] sm:$0xf]  ;;  %v494_v56 = vmax.f32 %v462_v41, %v478_v35 }
 0x100   :  { %v476_v42 = vld [vmem:[#allocation2 + $0x62] sm:$0xf]  ;;  %v234_v43 = vld [vmem:[#allocation2 + $0x39] sm:$0xf]  ;;  %v395_v44 = vmax.f32 %v363_v30, %v379_v38  ;;  %v323_v45 = vld [vmem:[#allocation2 + $0x8a] sm:$0xf]  ;;  %v493_v48 = vmax.f32 %v461_v37, %v477_v34 }
 0x101   :  { %v492_v47 = vmax.f32 %v460_v36, %v476_v42  ;;  %v475_v49 = vld [vmem:[#allocation2 + $0x4a] sm:$0xf]  ;;  %v339_v50 = vmax.f32 %v307_v40, %v323_v45  ;;  %v233_v53 = vld [vmem:[#allocation2 + $0x31] sm:$0xf]  ;;  %v419_v59 = vld [vmem:[#allocation2 + $0x98] sm:$0xf] }
 0x102   :  { %v232_v52 = vld [vmem:[#allocation2 + $0x29] sm:$0xf]  ;;  %v351_v55 = vld [vmem:[#allocation2 + $0x70] sm:$0xf]  ;;  %v427_v57 = vmax.f32 %v395_v44, %v411_v24  ;;  %v280_v63 = vld [vmem:[#allocation2 + $0x21] sm:$0xf] }
 0x103   :  { %v249_v54 = vld [vmem:[#allocation2 + $0x28] sm:$0xf]  ;;  %v355_v58 = vld [vmem:[#allocation2 + $0x90] sm:$0xf]  ;;  %v264_v61 = vmax.f32 %v232_v52, %v248_v32  ;;  %v312_v0 = vld [vmem:[#allocation2 + $0x22] sm:$0xf]  ;;  %v686_v1 = vmax.f32 %v335_v33, %v351_v55 }
 0x104   :  { %v250_v60 = vld [vmem:[#allocation2 + $0x30] sm:$0xf]  ;;  %v265_v62 = vmax.f32 %v233_v53, %v249_v54  ;;  %508 = vst.msk [vmem:[%s747_s3 + $0x20] sm:$0xf] %vm195_vm5, %v492_v47  ;;  %509 = vst.msk [vmem:[%s747_s3 + $0x24] sm:$0xf] %vm195_vm5, %v493_v48  ;;  %v371_v51 = vmax.f32 %v339_v50, %v355_v58  ;;  %v459_v5 = vmax.f32 %v427_v57, %v443_v39 }
 0x105   :  { %v266_v2 = vmax.f32 %v234_v43, %v250_v60  ;;  %v281_v3 = vld [vmem:[#allocation2 + $0x29] sm:$0xf]  ;;  %v696_v4 = vld [vmem:[#allocation2 + $0x72] sm:$0xf]  ;;  %510 = vst.msk [vmem:[%s747_s3 + $0x28] sm:$0xf] %vm195_vm5, %v494_v56  ;;  %v296_v10 = vmax.f32 %v264_v61, %v280_v63 }
 0x106   :  { %v242_v6 = vld [vmem:[#allocation2 + $0x89] sm:$0xf]  ;;  %v387_v7 = vld [vmem:[#allocation2 + $0x92] sm:$0xf]  ;;  %v451_v8 = vld [vmem:[#allocation2 + $0x99] sm:$0xf]  ;;  %v297_v11 = vmax.f32 %v265_v62, %v281_v3  ;;  %v491_v18 = vmax.f32 %v459_v5, %v475_v49  ;;  %v399_v27 = vmax.f32 %v686_v1, %v696_v4 }
 0x107   :  { %v282_v9 = vld [vmem:[#allocation2 + $0x31] sm:$0xf]  ;;  %v403_v13 = vmax.f32 %v371_v51, %v387_v7  ;;  %v313_v15 = vld [vmem:[#allocation2 + $0x2a] sm:$0xf]  ;;  %v483_v19 = vld [vmem:[#allocation2 + $0x9a] sm:$0xf]  ;;  %v328_v20 = vmax.f32 %v296_v10, %v312_v0 }
 0x108   :  { %v256_v12 = vld [vmem:[#allocation2 + $0x70] sm:$0xf]  ;;  %v298_v14 = vmax.f32 %v266_v2, %v282_v9  ;;  %v407_v17 = vld [vmem:[#allocation2 + $0x28] sm:$0xf]  ;;  %v329_v21 = vmax.f32 %v297_v11, %v313_v15  ;;  %v240_v30 = vld [vmem:[#allocation2 + $0x79] sm:$0xf] }
 0x109   :  { %v314_v16 = vld [vmem:[#allocation2 + $0x32] sm:$0xf]  ;;  %v344_v22 = vld [vmem:[#allocation2 + $0x28] sm:$0xf]  ;;  %v423_v24 = vmax.f32 %v391_v46, %v407_v17  ;;  %v435_v28 = vmax.f32 %v403_v13, %v419_v59  ;;  %v241_v31 = vld [vmem:[#allocation2 + $0x81] sm:$0xf]  ;;  %v272_v39 = vmax.f32 %v240_v30, %v256_v12 }
 0x10a   :  { %v345_v23 = vld [vmem:[#allocation2 + $0x30] sm:$0xf]  ;;  %v439_v25 = vld [vmem:[#allocation2 + $0x29] sm:$0xf]  ;;  %v330_v29 = vmax.f32 %v298_v14, %v314_v16  ;;  %v257_v32 = vld [vmem:[#allocation2 + $0x78] sm:$0xf]  ;;  %v360_v35 = vmax.f32 %v328_v20, %v344_v22 }
 0x10b   :  { %v288_v26 = vld [vmem:[#allocation2 + $0x71] sm:$0xf]  ;;  %v346_v33 = vld [vmem:[#allocation2 + $0x38] sm:$0xf]  ;;  %507 = vst.msk [vmem:[%s747_s3 + $0x1c] sm:$0xf] %vm195_vm5, %v491_v18  ;;  %v361_v36 = vmax.f32 %v329_v21, %v345_v23  ;;  %v455_v37 = vmax.f32 %v423_v24, %v439_v25  ;;  %v467_v42 = vmax.f32 %v435_v28, %v451_v8  ;;  %v273_v47 = vmax.f32 %v241_v31, %v257_v32 }
 0x10c   :  { %v378_v34 = vld [vmem:[#allocation2 + $0x3a] sm:$0xf]  ;;  %v258_v38 = vld [vmem:[#allocation2 + $0x80] sm:$0xf]  ;;  %v320_v40 = vld [vmem:[#allocation2 + $0x72] sm:$0xf]  ;;  %v362_v43 = vmax.f32 %v330_v29, %v346_v33  ;;  %v304_v56 = vmax.f32 %v272_v39, %v288_v26 }
 0x10d   :  { %v409_v41 = vld [vmem:[#allocation2 + $0x38] sm:$0xf]  ;;  %v376_v44 = vld [vmem:[#allocation2 + $0x2a] sm:$0xf]  ;;  %v377_v45 = vld [vmem:[#allocation2 + $0x32] sm:$0xf]  ;;  %v274_v48 = vmax.f32 %v242_v6, %v258_v38  ;;  %v499_v58 = vmax.f32 %v467_v42, %v483_v19 }
 0x10e   :  { %v471_v46 = vld [vmem:[#allocation2 + $0x2a] sm:$0xf]  ;;  %v410_v49 = vld [vmem:[#allocation2 + $0x40] sm:$0xf]  ;;  %v392_v50 = vmax.f32 %v360_v35, %v376_v44  ;;  %v393_v52 = vmax.f32 %v361_v36, %v377_v45  ;;  %v289_v54 = vld [vmem:[#allocation2 + $0x79] sm:$0xf]  ;;  %v394_v59 = vmax.f32 %v362_v43, %v378_v34  ;;  %v336_v4 = vmax.f32 %v304_v56, %v320_v40 }
 0x10f   :  { %v487_v53 = vmax.f32 %v455_v37, %v471_v46  ;;  %v290_v55 = vld [vmem:[#allocation2 + $0x81] sm:$0xf]  ;;  %v441_v57 = vld [vmem:[#allocation2 + $0x39] sm:$0xf]  ;;  %v408_v60 = vld [vmem:[#allocation2 + $0x30] sm:$0xf]  ;;  %v305_v61 = vmax.f32 %v273_v47, %v289_v54 }
 0x110   :  { %v306_v62 = vmax.f32 %v274_v48, %v290_v55  ;;  %v415_v63 = vld [vmem:[#allocation2 + $0x78] sm:$0xf]  ;;  %v442_v0 = vld [vmem:[#allocation2 + $0x41] sm:$0xf]  ;;  %v424_v1 = vmax.f32 %v392_v50, %v408_v60  ;;  %v425_v51 = vmax.f32 %v393_v52, %v409_v41  ;;  %515 = vst.msk [vmem:[%s747_s3 + $0x3c] sm:$0xf] %vm195_vm5, %v499_v58  ;;  %v426_v6 = vmax.f32 %v394_v59, %v410_v49 }
 0x111   :  { %503 = vst.msk [vmem:[%s747_s3 + $0xc] sm:$0xf] %vm195_vm5, %v487_v53  ;;  %v321_v2 = vld [vmem:[#allocation2 + $0x7a] sm:$0xf]  ;;  %v322_v3 = vld [vmem:[#allocation2 + $0x82] sm:$0xf]  ;;  %v431_v5 = vmax.f32 %v399_v27, %v415_v63 }
 0x112   :  { %v440_v7 = vld [vmem:[#allocation2 + $0x31] sm:$0xf]  ;;  %v337_v8 = vmax.f32 %v305_v61, %v321_v2  ;;  %v338_v9 = vmax.f32 %v306_v62, %v322_v3  ;;  %v352_v10 = vld [vmem:[#allocation2 + $0x78] sm:$0xf]  ;;  %v354_v13 = vld [vmem:[#allocation2 + $0x88] sm:$0xf]  ;;  %v457_v15 = vmax.f32 %v425_v51, %v441_v57  ;;  %v458_v19 = vmax.f32 %v426_v6, %v442_v0 }
 0x113   :  { %v447_v11 = vld [vmem:[#allocation2 + $0x79] sm:$0xf]  ;;  %v456_v14 = vmax.f32 %v424_v1, %v440_v7  ;;  %v353_v16 = vld [vmem:[#allocation2 + $0x80] sm:$0xf]  ;;  %v368_v17 = vmax.f32 %v336_v4, %v352_v10  ;;  %v472_v20 = vld [vmem:[#allocation2 + $0x32] sm:$0xf] }
 0x114   :  { %v473_v12 = vld [vmem:[#allocation2 + $0x3a] sm:$0xf]  ;;  %v463_v18 = vmax.f32 %v431_v5, %v447_v11  ;;  %v369_v21 = vmax.f32 %v337_v8, %v353_v16  ;;  %v370_v22 = vmax.f32 %v338_v9, %v354_v13  ;;  %v474_v25 = vld [vmem:[#allocation2 + $0x42] sm:$0xf]  ;;  %v386_v26 = vld [vmem:[#allocation2 + $0x8a] sm:$0xf] }
 0x115   :  { %v384_v23 = vld [vmem:[#allocation2 + $0x7a] sm:$0xf]  ;;  %v488_v27 = vmax.f32 %v456_v14, %v472_v20  ;;  %v489_v28 = vmax.f32 %v457_v15, %v473_v12  ;;  %v385_v29 = vld [vmem:[#allocation2 + $0x82] sm:$0xf]  ;;  %v490_v32 = vmax.f32 %v458_v19, %v474_v25  ;;  %v417_v36 = vld [vmem:[#allocation2 + $0x88] sm:$0xf] }
 0x116   :  { %v479_v24 = vld [vmem:[#allocation2 + $0x7a] sm:$0xf]  ;;  %v400_v30 = vmax.f32 %v368_v17, %v384_v23  ;;  %v401_v33 = vmax.f32 %v369_v21, %v385_v29  ;;  %v402_v34 = vmax.f32 %v370_v22, %v386_v26  ;;  %v416_v35 = vld [vmem:[#allocation2 + $0x80] sm:$0xf]  ;;  %v418_v37 = vld [vmem:[#allocation2 + $0x90] sm:$0xf] }
 0x117   :  { %v495_v31 = vmax.f32 %v463_v18, %v479_v24  ;;  %504 = vst.msk [vmem:[%s747_s3 + $0x10] sm:$0xf] %vm195_vm5, %v488_v27  ;;  %505 = vst.msk [vmem:[%s747_s3 + $0x14] sm:$0xf] %vm195_vm5, %v489_v28  ;;  %v448_v41 = vld [vmem:[#allocation2 + $0x81] sm:$0xf] }
 0x118   :  { %v432_v38 = vmax.f32 %v400_v30, %v416_v35  ;;  %506 = vst.msk [vmem:[%s747_s3 + $0x18] sm:$0xf] %vm195_vm5, %v490_v32  ;;  %v433_v39 = vmax.f32 %v401_v33, %v417_v36  ;;  %v434_v40 = vmax.f32 %v402_v34, %v418_v37  ;;  %v449_v42 = vld [vmem:[#allocation2 + $0x89] sm:$0xf]  ;;  %v450_v43 = vld [vmem:[#allocation2 + $0x91] sm:$0xf] }
 0x119   :  { %511 = vst.msk [vmem:[%s747_s3 + $0x2c] sm:$0xf] %vm195_vm5, %v495_v31  ;;  %v480_v47 = vld [vmem:[#allocation2 + $0x82] sm:$0xf]  ;;  %v481_v48 = vld [vmem:[#allocation2 + $0x8a] sm:$0xf] }
 0x11a   :  { %v464_v44 = vmax.f32 %v432_v38, %v448_v41  ;;  %v465_v45 = vmax.f32 %v433_v39, %v449_v42  ;;  %v466_v46 = vmax.f32 %v434_v40, %v450_v43  ;;  %v482_v49 = vld [vmem:[#allocation2 + $0x92] sm:$0xf] }
 0x11c   :  { %v496_v50 = vmax.f32 %v464_v44, %v480_v47  ;;  %v497_v52 = vmax.f32 %v465_v45, %v481_v48  ;;  %v498_v53 = vmax.f32 %v466_v46, %v482_v49 }
 0x11e   :  { %512 = vst.msk [vmem:[%s747_s3 + $0x30] sm:$0xf] %vm195_vm5, %v496_v50  ;;  %513 = vst.msk [vmem:[%s747_s3 + $0x34] sm:$0xf] %vm195_vm5, %v497_v52 }
 0x11f   :  { %514 = vst.msk [vmem:[%s747_s3 + $0x38] sm:$0xf] %vm195_vm5, %v498_v53 }

// kernel: cnn_lstm_forward.3
= control target key start
LH: loop header
LB: loop body
LE: loop exit
PB: predicated region body
PF: predicated region fallthrough
CT: control target
= control target key end

     0   :  { %s3124_s0 = inlined_call_operand.vmem [shape: f32[16,256], index: 0, kind: input, shape index: {}]   ;;  %s3125_s1 = inlined_call_operand.vmem [shape: f32[256,512], index: 1, kind: input, shape index: {}]   ;;  %s3126_s2 = inlined_call_operand.vmem [shape: f32[128,512], index: 2, kind: input, shape index: {}]   ;;  %s3127_s3 = inlined_call_operand.vmem [shape: f32[1,512], index: 3, kind: input, shape index: {}]   ;;  %s3128_s4 = inlined_call_operand.vmem [shape: f32[128,256], index: 4, kind: input, shape index: {}]   ;;  %s3129_s5 = inlined_call_operand.vmem [shape: f32[64,256], index: 5, kind: input, shape index: {}]   ;;  %s3130_s6 = inlined_call_operand.vmem [shape: f32[1,256], index: 6, kind: input, shape index: {}]   ;;  %s3131_s7 = inlined_call_operand.vmem [shape: f32[64,32], index: 7, kind: input, shape index: {}]   ;;  %s3132_s8 = inlined_call_operand.vmem [shape: f32[1,32], index: 8, kind: input, shape index: {}]   ;;  %s3133_s9 = inlined_call_operand.vmem [shape: f32[32,7], index: 9, kind: input, shape index: {}]   ;;  %s3134_s10 = inlined_call_operand.vmem [shape: f32[1,7], index: 10, kind: input, shape index: {}]   ;;  %s3135_s11 = inlined_call_operand.hbm [shape: f32[2,7], index: 11, kind: output, shape index: {}]  }
   0x1   :  { %v44_v0 = vld [vmem:[%s3125_s1 + $0x8] sm:$0xff]  ;;  %v46_v2 = vld [vmem:[%s3125_s1 + $0x18] sm:$0xff]  ;;  %v43_v5 = vld [vmem:[%s3125_s1] sm:$0xff] }
   0x2   :  { %v48_v1 = vld [vmem:[%s3125_s1 + $0x28] sm:$0xff]  ;;  %v50_v4 = vld [vmem:[%s3125_s1 + $0x38] sm:$0xff]  ;;  %v47_v6 = vld [vmem:[%s3125_s1 + $0x20] sm:$0xff] }
   0x3   :  { %v1534_v3 = vpack.c.bf16 %v48_v1, %v44_v0  ;;  %v1598_v7 = vpack.c.bf16 %v50_v4, %v46_v2  ;;  %v1536_v8 = vpack.c.bf16 %v47_v6, %v43_v5  ;;  %v45_v9 = vld [vmem:[%s3125_s1 + $0x10] sm:$0xff]  ;;  %v52_v11 = vld [vmem:[%s3125_s1 + $0x48] sm:$0xff]  ;;  %v54_v14 = vld [vmem:[%s3125_s1 + $0x58] sm:$0xff] }
   0x4   :  { %v49_v10 = vld [vmem:[%s3125_s1 + $0x30] sm:$0xff]  ;;  %v56_v13 = vld [vmem:[%s3125_s1 + $0x68] sm:$0xff]  ;;  %v58_v15 = vld [vmem:[%s3125_s1 + $0x78] sm:$0xff] }
   0x5   :  { %1535 = vmatprep.subr.bf16.mxu0 %v1534_v3  ;;  %v1600_v12 = vpack.c.bf16 %v49_v10, %v45_v9  ;;  %1599 = vmatprep.subr.bf16.mxu1 %v1598_v7  ;;  %v1538_v16 = vpack.c.bf16 %v56_v13, %v52_v11  ;;  %v1602_v17 = vpack.c.bf16 %v58_v15, %v54_v14  ;;  %v51_v18 = vld [vmem:[%s3125_s1 + $0x40] sm:$0xff]  ;;  %v53_v20 = vld [vmem:[%s3125_s1 + $0x50] sm:$0xff]  ;;  %v60_v23 = vld [vmem:[%s3125_s1 + $0x88] sm:$0xff] }
   0x6   :  { %1537 = vmatpush1.bf16.msra.mxu0 %v1536_v8  ;;  %v55_v19 = vld [vmem:[%s3125_s1 + $0x60] sm:$0xff]  ;;  %v57_v22 = vld [vmem:[%s3125_s1 + $0x70] sm:$0xff]  ;;  %v64_v24 = vld [vmem:[%s3125_s1 + $0xa8] sm:$0xff] }
   0x7   :  { %1601 = vmatpush1.bf16.msra.mxu1 %v1600_v12  ;;  %v1540_v21 = vpack.c.bf16 %v55_v19, %v51_v18  ;;  %1539 = vmatprep.subr.bf16.mxu0 %v1538_v16  ;;  %v1604_v25 = vpack.c.bf16 %v57_v22, %v53_v20  ;;  %v1542_v26 = vpack.c.bf16 %v64_v24, %v60_v23  ;;  %v62_v27 = vld [vmem:[%s3125_s1 + $0x98] sm:$0xff]  ;;  %v59_v29 = vld [vmem:[%s3125_s1 + $0x80] sm:$0xff]  ;;  %v61_v32 = vld [vmem:[%s3125_s1 + $0x90] sm:$0xff] }
   0x8   :  { %1603 = vmatprep.subr.bf16.mxu1 %v1602_v17  ;;  %v66_v28 = vld [vmem:[%s3125_s1 + $0xb8] sm:$0xff]  ;;  %v63_v31 = vld [vmem:[%s3125_s1 + $0xa0] sm:$0xff]  ;;  %v65_v33 = vld [vmem:[%s3125_s1 + $0xb0] sm:$0xff] }
   0x9   :  { %v1606_v30 = vpack.c.bf16 %v66_v28, %v62_v27  ;;  %v1544_v34 = vpack.c.bf16 %v63_v31, %v59_v29  ;;  %v68_v35 = vld [vmem:[%s3125_s1 + $0xc8] sm:$0xff]  ;;  %v70_v37 = vld [vmem:[%s3125_s1 + $0xd8] sm:$0xff]  ;;  %v1608_v38 = vpack.c.bf16 %v65_v33, %v61_v32  ;;  %v67_v41 = vld [vmem:[%s3125_s1 + $0xc0] sm:$0xff] }
   0xa   :  { %1541 = vmatpush1.bf16.msra.mxu0 %v1540_v21  ;;  %v72_v36 = vld [vmem:[%s3125_s1 + $0xe8] sm:$0xff]  ;;  %v74_v40 = vld [vmem:[%s3125_s1 + $0xf8] sm:$0xff]  ;;  %v71_v42 = vld [vmem:[%s3125_s1 + $0xe0] sm:$0xff] }
   0xb   :  { %1605 = vmatpush1.bf16.msra.mxu1 %v1604_v25  ;;  %1543 = vmatprep.subr.bf16.mxu0 %v1542_v26  ;;  %v1546_v39 = vpack.c.bf16 %v72_v36, %v68_v35  ;;  %v1610_v43 = vpack.c.bf16 %v74_v40, %v70_v37  ;;  %v69_v44 = vld [vmem:[%s3125_s1 + $0xd0] sm:$0xff]  ;;  %v76_v46 = vld [vmem:[%s3125_s1 + $0x108] sm:$0xff]  ;;  %v78_v48 = vld [vmem:[%s3125_s1 + $0x118] sm:$0xff]  ;;  %v1548_v50 = vpack.c.bf16 %v71_v42, %v67_v41 }
   0xc   :  { %1607 = vmatprep.subr.bf16.mxu1 %v1606_v30  ;;  %v73_v45 = vld [vmem:[%s3125_s1 + $0xf0] sm:$0xff]  ;;  %v80_v47 = vld [vmem:[%s3125_s1 + $0x128] sm:$0xff]  ;;  %v82_v49 = vld [vmem:[%s3125_s1 + $0x138] sm:$0xff] }
   0xd   :  { %v1612_v51 = vpack.c.bf16 %v73_v45, %v69_v44  ;;  %v1550_v52 = vpack.c.bf16 %v80_v47, %v76_v46  ;;  %v75_v53 = vld [vmem:[%s3125_s1 + $0x100] sm:$0xff]  ;;  %v77_v55 = vld [vmem:[%s3125_s1 + $0x110] sm:$0xff]  ;;  %v1614_v56 = vpack.c.bf16 %v82_v49, %v78_v48  ;;  %v84_v58 = vld [vmem:[%s3125_s1 + $0x148] sm:$0xff] }
   0xe   :  { %1545 = vmatpush1.bf16.msra.mxu0 %v1544_v34  ;;  %v79_v54 = vld [vmem:[%s3125_s1 + $0x120] sm:$0xff]  ;;  %v81_v57 = vld [vmem:[%s3125_s1 + $0x130] sm:$0xff]  ;;  %v88_v59 = vld [vmem:[%s3125_s1 + $0x168] sm:$0xff] }
   0xf   :  { %1609 = vmatpush1.bf16.msra.mxu1 %v1608_v38  ;;  %1547 = vmatprep.subr.bf16.mxu0 %v1546_v39  ;;  %v86_v60 = vld [vmem:[%s3125_s1 + $0x158] sm:$0xff]  ;;  %v1552_v62 = vpack.c.bf16 %v79_v54, %v75_v53  ;;  %v1616_v63 = vpack.c.bf16 %v81_v57, %v77_v55  ;;  %v1554_v0 = vpack.c.bf16 %v88_v59, %v84_v58  ;;  %v83_v1 = vld [vmem:[%s3125_s1 + $0x140] sm:$0xff]  ;;  %v85_v3 = vld [vmem:[%s3125_s1 + $0x150] sm:$0xff] }
  0x10   :  { %1611 = vmatprep.subr.bf16.mxu1 %v1610_v43  ;;  %v90_v61 = vld [vmem:[%s3125_s1 + $0x178] sm:$0xff]  ;;  %v87_v2 = vld [vmem:[%s3125_s1 + $0x160] sm:$0xff]  ;;  %v89_v5 = vld [vmem:[%s3125_s1 + $0x170] sm:$0xff] }
  0x11   :  { %v1618_v4 = vpack.c.bf16 %v90_v61, %v86_v60  ;;  %v92_v6 = vld [vmem:[%s3125_s1 + $0x188] sm:$0xff]  ;;  %v94_v8 = vld [vmem:[%s3125_s1 + $0x198] sm:$0xff]  ;;  %v1556_v10 = vpack.c.bf16 %v87_v2, %v83_v1  ;;  %v1620_v11 = vpack.c.bf16 %v89_v5, %v85_v3  ;;  %v91_v13 = vld [vmem:[%s3125_s1 + $0x180] sm:$0xff] }
  0x12   :  { %1549 = vmatpush1.bf16.msra.mxu0 %v1548_v50  ;;  %v96_v7 = vld [vmem:[%s3125_s1 + $0x1a8] sm:$0xff]  ;;  %v98_v9 = vld [vmem:[%s3125_s1 + $0x1b8] sm:$0xff]  ;;  %v95_v14 = vld [vmem:[%s3125_s1 + $0x1a0] sm:$0xff] }
  0x13   :  { %1613 = vmatpush1.bf16.msra.mxu1 %v1612_v51  ;;  %1551 = vmatprep.subr.bf16.mxu0 %v1550_v52  ;;  %v1558_v12 = vpack.c.bf16 %v96_v7, %v92_v6  ;;  %v93_v15 = vld [vmem:[%s3125_s1 + $0x190] sm:$0xff]  ;;  %v1622_v16 = vpack.c.bf16 %v98_v9, %v94_v8  ;;  %v100_v18 = vld [vmem:[%s3125_s1 + $0x1c8] sm:$0xff]  ;;  %v102_v20 = vld [vmem:[%s3125_s1 + $0x1d8] sm:$0xff]  ;;  %v1560_v22 = vpack.c.bf16 %v95_v14, %v91_v13 }
  0x14   :  { %1615 = vmatprep.subr.bf16.mxu1 %v1614_v56  ;;  %v97_v17 = vld [vmem:[%s3125_s1 + $0x1b0] sm:$0xff]  ;;  %v104_v19 = vld [vmem:[%s3125_s1 + $0x1e8] sm:$0xff]  ;;  %v106_v21 = vld [vmem:[%s3125_s1 + $0x1f8] sm:$0xff] }
  0x15   :  { %v1624_v23 = vpack.c.bf16 %v97_v17, %v93_v15  ;;  %v1562_v24 = vpack.c.bf16 %v104_v19, %v100_v18  ;;  %v99_v25 = vld [vmem:[%s3125_s1 + $0x1c0] sm:$0xff]  ;;  %v101_v27 = vld [vmem:[%s3125_s1 + $0x1d0] sm:$0xff]  ;;  %v1626_v28 = vpack.c.bf16 %v106_v21, %v102_v20  ;;  %v108_v30 = vld [vmem:[%s3125_s1 + $0x208] sm:$0xff] }
  0x16   :  { %1553 = vmatpush1.bf16.msra.mxu0 %v1552_v62  ;;  %v103_v26 = vld [vmem:[%s3125_s1 + $0x1e0] sm:$0xff]  ;;  %v105_v29 = vld [vmem:[%s3125_s1 + $0x1f0] sm:$0xff]  ;;  %v112_v31 = vld [vmem:[%s3125_s1 + $0x228] sm:$0xff] }
  0x17   :  { %1617 = vmatpush1.bf16.msra.mxu1 %v1616_v63  ;;  %1555 = vmatprep.subr.bf16.mxu0 %v1554_v0  ;;  %v110_v32 = vld [vmem:[%s3125_s1 + $0x218] sm:$0xff]  ;;  %v1564_v34 = vpack.c.bf16 %v103_v26, %v99_v25  ;;  %v1628_v35 = vpack.c.bf16 %v105_v29, %v101_v27  ;;  %v1566_v36 = vpack.c.bf16 %v112_v31, %v108_v30  ;;  %v107_v37 = vld [vmem:[%s3125_s1 + $0x200] sm:$0xff]  ;;  %v109_v39 = vld [vmem:[%s3125_s1 + $0x210] sm:$0xff] }
  0x18   :  { %1619 = vmatprep.subr.bf16.mxu1 %v1618_v4  ;;  %v114_v33 = vld [vmem:[%s3125_s1 + $0x238] sm:$0xff]  ;;  %v111_v38 = vld [vmem:[%s3125_s1 + $0x220] sm:$0xff]  ;;  %v113_v41 = vld [vmem:[%s3125_s1 + $0x230] sm:$0xff] }
  0x19   :  { %v1630_v40 = vpack.c.bf16 %v114_v33, %v110_v32  ;;  %v116_v42 = vld [vmem:[%s3125_s1 + $0x248] sm:$0xff]  ;;  %v118_v44 = vld [vmem:[%s3125_s1 + $0x258] sm:$0xff]  ;;  %v1568_v46 = vpack.c.bf16 %v111_v38, %v107_v37  ;;  %v1632_v47 = vpack.c.bf16 %v113_v41, %v109_v39  ;;  %v115_v49 = vld [vmem:[%s3125_s1 + $0x240] sm:$0xff] }
  0x1a   :  { %1557 = vmatpush1.bf16.msra.mxu0 %v1556_v10  ;;  %v120_v43 = vld [vmem:[%s3125_s1 + $0x268] sm:$0xff]  ;;  %v122_v45 = vld [vmem:[%s3125_s1 + $0x278] sm:$0xff]  ;;  %v119_v50 = vld [vmem:[%s3125_s1 + $0x260] sm:$0xff] }
  0x1b   :  { %1621 = vmatpush1.bf16.msra.mxu1 %v1620_v11  ;;  %1559 = vmatprep.subr.bf16.mxu0 %v1558_v12  ;;  %v1570_v48 = vpack.c.bf16 %v120_v43, %v116_v42  ;;  %v117_v51 = vld [vmem:[%s3125_s1 + $0x250] sm:$0xff]  ;;  %v1634_v52 = vpack.c.bf16 %v122_v45, %v118_v44  ;;  %v124_v54 = vld [vmem:[%s3125_s1 + $0x288] sm:$0xff]  ;;  %v126_v56 = vld [vmem:[%s3125_s1 + $0x298] sm:$0xff]  ;;  %v1572_v58 = vpack.c.bf16 %v119_v50, %v115_v49 }
  0x1c   :  { %1623 = vmatprep.subr.bf16.mxu1 %v1622_v16  ;;  %v121_v53 = vld [vmem:[%s3125_s1 + $0x270] sm:$0xff]  ;;  %v128_v55 = vld [vmem:[%s3125_s1 + $0x2a8] sm:$0xff]  ;;  %v130_v57 = vld [vmem:[%s3125_s1 + $0x2b8] sm:$0xff] }
  0x1d   :  { %v1636_v59 = vpack.c.bf16 %v121_v53, %v117_v51  ;;  %v1574_v60 = vpack.c.bf16 %v128_v55, %v124_v54  ;;  %v123_v61 = vld [vmem:[%s3125_s1 + $0x280] sm:$0xff]  ;;  %v125_v63 = vld [vmem:[%s3125_s1 + $0x290] sm:$0xff]  ;;  %v1638_v0 = vpack.c.bf16 %v130_v57, %v126_v56  ;;  %v132_v2 = vld [vmem:[%s3125_s1 + $0x2c8] sm:$0xff] }
  0x1e   :  { %1561 = vmatpush1.bf16.msra.mxu0 %v1560_v22  ;;  %v127_v62 = vld [vmem:[%s3125_s1 + $0x2a0] sm:$0xff]  ;;  %v129_v1 = vld [vmem:[%s3125_s1 + $0x2b0] sm:$0xff]  ;;  %v136_v3 = vld [vmem:[%s3125_s1 + $0x2e8] sm:$0xff] }
  0x1f   :  { %1625 = vmatpush1.bf16.msra.mxu1 %v1624_v23  ;;  %1563 = vmatprep.subr.bf16.mxu0 %v1562_v24  ;;  %v134_v4 = vld [vmem:[%s3125_s1 + $0x2d8] sm:$0xff]  ;;  %v1576_v6 = vpack.c.bf16 %v127_v62, %v123_v61  ;;  %v131_v7 = vld [vmem:[%s3125_s1 + $0x2c0] sm:$0xff]  ;;  %v1640_v8 = vpack.c.bf16 %v129_v1, %v125_v63  ;;  %v1578_v9 = vpack.c.bf16 %v136_v3, %v132_v2  ;;  %v133_v11 = vld [vmem:[%s3125_s1 + $0x2d0] sm:$0xff] }
  0x20   :  { %1627 = vmatprep.subr.bf16.mxu1 %v1626_v28  ;;  %v138_v5 = vld [vmem:[%s3125_s1 + $0x2f8] sm:$0xff]  ;;  %v135_v10 = vld [vmem:[%s3125_s1 + $0x2e0] sm:$0xff]  ;;  %v137_v12 = vld [vmem:[%s3125_s1 + $0x2f0] sm:$0xff] }
  0x21   :  { %v1642_v13 = vpack.c.bf16 %v138_v5, %v134_v4  ;;  %v140_v14 = vld [vmem:[%s3125_s1 + $0x308] sm:$0xff]  ;;  %v142_v17 = vld [vmem:[%s3125_s1 + $0x318] sm:$0xff]  ;;  %v1580_v19 = vpack.c.bf16 %v135_v10, %v131_v7  ;;  %v1644_v20 = vpack.c.bf16 %v137_v12, %v133_v11  ;;  %v139_v22 = vld [vmem:[%s3125_s1 + $0x300] sm:$0xff] }
  0x22   :  { %1565 = vmatpush1.bf16.msra.mxu0 %v1564_v34  ;;  %v144_v15 = vld [vmem:[%s3125_s1 + $0x328] sm:$0xff]  ;;  %v146_v18 = vld [vmem:[%s3125_s1 + $0x338] sm:$0xff]  ;;  %v143_v23 = vld [vmem:[%s3125_s1 + $0x320] sm:$0xff] }
  0x23   :  { %1629 = vmatpush1.bf16.msra.mxu1 %v1628_v35  ;;  %1567 = vmatprep.subr.bf16.mxu0 %v1566_v36  ;;  %v40_v16 = vld [vmem:[%s3124_s0 + $0x8] sm:$0xff]  ;;  %v1582_v21 = vpack.c.bf16 %v144_v15, %v140_v14  ;;  %v141_v24 = vld [vmem:[%s3125_s1 + $0x310] sm:$0xff]  ;;  %v1646_v25 = vpack.c.bf16 %v146_v18, %v142_v17  ;;  %v150_v29 = vld [vmem:[%s3125_s1 + $0x358] sm:$0xff]  ;;  %v1584_v31 = vpack.c.bf16 %v143_v23, %v139_v22 }
  0x24   :  { %1631 = vmatprep.subr.bf16.mxu1 %v1630_v40  ;;  %257 = vmatprep.mubr.f32.mxu0 %v40_v16  ;;  %v145_v26 = vld [vmem:[%s3125_s1 + $0x330] sm:$0xff]  ;;  %v148_v27 = vld [vmem:[%s3125_s1 + $0x348] sm:$0xff]  ;;  %v154_v30 = vld [vmem:[%s3125_s1 + $0x378] sm:$0xff] }
  0x25   :  { %334 = vmatprep.mubr.f32.mxu1 %v40_v16  ;;  %v152_v28 = vld [vmem:[%s3125_s1 + $0x368] sm:$0xff]  ;;  %v1648_v32 = vpack.c.bf16 %v145_v26, %v141_v24  ;;  %v147_v34 = vld [vmem:[%s3125_s1 + $0x340] sm:$0xff]  ;;  %v149_v36 = vld [vmem:[%s3125_s1 + $0x350] sm:$0xff]  ;;  %v1650_v37 = vpack.c.bf16 %v154_v30, %v150_v29 }
  0x26   :  { %1569 = vmatpush1.bf16.msra.mxu0 %v1568_v46  ;;  %v1586_v33 = vpack.c.bf16 %v152_v28, %v148_v27  ;;  %v151_v35 = vld [vmem:[%s3125_s1 + $0x360] sm:$0xff]  ;;  %v153_v38 = vld [vmem:[%s3125_s1 + $0x370] sm:$0xff]  ;;  %v156_v39 = vld [vmem:[%s3125_s1 + $0x388] sm:$0xff] }
  0x27   :  { %1633 = vmatpush1.bf16.msra.mxu1 %v1632_v47  ;;  %1571 = vmatprep.subr.bf16.mxu0 %v1570_v48  ;;  %v160_v40 = vld [vmem:[%s3125_s1 + $0x3a8] sm:$0xff]  ;;  %v158_v41 = vld [vmem:[%s3125_s1 + $0x398] sm:$0xff]  ;;  %v1588_v43 = vpack.c.bf16 %v151_v35, %v147_v34  ;;  %v1652_v44 = vpack.c.bf16 %v153_v38, %v149_v36  ;;  %v155_v46 = vld [vmem:[%s3125_s1 + $0x380] sm:$0xff] }
  0x28   :  { %1635 = vmatprep.subr.bf16.mxu1 %v1634_v52  ;;  %v162_v42 = vld [vmem:[%s3125_s1 + $0x3b8] sm:$0xff]  ;;  %v1590_v45 = vpack.c.bf16 %v160_v40, %v156_v39  ;;  %v159_v47 = vld [vmem:[%s3125_s1 + $0x3a0] sm:$0xff]  ;;  %v157_v48 = vld [vmem:[%s3125_s1 + $0x390] sm:$0xff] }
  0x29   :  { %v1654_v49 = vpack.c.bf16 %v162_v42, %v158_v41  ;;  %v161_v50 = vld [vmem:[%s3125_s1 + $0x3b0] sm:$0xff]  ;;  %v164_v51 = vld [vmem:[%s3125_s1 + $0x3c8] sm:$0xff]  ;;  %v166_v53 = vld [vmem:[%s3125_s1 + $0x3d8] sm:$0xff]  ;;  %v1592_v55 = vpack.c.bf16 %v159_v47, %v155_v46 }
  0x2a   :  { %1573 = vmatpush1.bf16.msra.mxu0 %v1572_v58  ;;  %v168_v52 = vld [vmem:[%s3125_s1 + $0x3e8] sm:$0xff]  ;;  %v170_v54 = vld [vmem:[%s3125_s1 + $0x3f8] sm:$0xff]  ;;  %v1656_v56 = vpack.c.bf16 %v161_v50, %v157_v48  ;;  %v163_v58 = vld [vmem:[%s3125_s1 + $0x3c0] sm:$0xff] }
  0x2b   :  { %1637 = vmatpush1.bf16.msra.mxu1 %v1636_v59  ;;  %1575 = vmatprep.subr.bf16.mxu0 %v1574_v60  ;;  %v1594_v57 = vpack.c.bf16 %v168_v52, %v164_v51  ;;  %v167_v59 = vld [vmem:[%s3125_s1 + $0x3e0] sm:$0xff]  ;;  %v165_v60 = vld [vmem:[%s3125_s1 + $0x3d0] sm:$0xff]  ;;  %v1658_v61 = vpack.c.bf16 %v170_v54, %v166_v53  ;;  %v348_v63 = vld [vmem:[%s3126_s2 + $0x8] sm:$0xff] }
  0x2c   :  { %1639 = vmatprep.subr.bf16.mxu1 %v1638_v0  ;;  %v169_v62 = vld [vmem:[%s3125_s1 + $0x3f0] sm:$0xff]  ;;  %v352_v0 = vld [vmem:[%s3126_s2 + $0x28] sm:$0xff]  ;;  %v350_v1 = vld [vmem:[%s3126_s2 + $0x18] sm:$0xff]  ;;  %v1596_v3 = vpack.c.bf16 %v167_v59, %v163_v58 }
  0x2d   :  { %v354_v2 = vld [vmem:[%s3126_s2 + $0x38] sm:$0xff]  ;;  %v1660_v4 = vpack.c.bf16 %v169_v62, %v165_v60  ;;  %v2473_v5 = vpack.c.bf16 %v352_v0, %v348_v63  ;;  %v351_v7 = vld [vmem:[%s3126_s2 + $0x20] sm:$0xff]  ;;  %v353_v10 = vld [vmem:[%s3126_s2 + $0x30] sm:$0xff] }
  0x2e   :  { %1577 = vmatpush1.bf16.msra.mxu0 %v1576_v6  ;;  %v347_v6 = vld [vmem:[%s3126_s2] sm:$0xff]  ;;  %v356_v11 = vld [vmem:[%s3126_s2 + $0x48] sm:$0xff]  ;;  %v362_v14 = vld [vmem:[%s3126_s2 + $0x78] sm:$0xff] }
  0x2f   :  { %1641 = vmatpush1.bf16.msra.mxu1 %v1640_v8  ;;  %1579 = vmatprep.subr.bf16.mxu0 %v1578_v9  ;;  %v349_v8 = vld [vmem:[%s3126_s2 + $0x10] sm:$0xff]  ;;  %v2484_v9 = vpack.c.bf16 %v354_v2, %v350_v1  ;;  %v360_v12 = vld [vmem:[%s3126_s2 + $0x68] sm:$0xff]  ;;  %v39_v15 = vld [vmem:[%s3124_s0] sm:$0xff]  ;;  %v2504_v16 = vpack.c.bf16 %v351_v7, %v347_v6 }
  0x30   :  { %1643 = vmatprep.subr.bf16.mxu1 %v1642_v13  ;;  %v358_v13 = vld [vmem:[%s3126_s2 + $0x58] sm:$0xff]  ;;  %v355_v17 = vld [vmem:[%s3126_s2 + $0x40] sm:$0xff]  ;;  %v2510_v18 = vpack.c.bf16 %v353_v10, %v349_v8  ;;  %v361_v22 = vld [vmem:[%s3126_s2 + $0x70] sm:$0xff] }
  0x31   :  { %v2524_v23 = vpack.c.bf16 %v362_v14, %v358_v13  ;;  %v364_v24 = vld [vmem:[%s3126_s2 + $0x88] sm:$0xff]  ;;  %v366_v26 = vld [vmem:[%s3126_s2 + $0x98] sm:$0xff] }
  0x32   :  { %1581 = vmatpush1.bf16.msra.mxu0 %v1580_v19  ;;  %v2512_v19 = vpack.c.bf16 %v360_v12, %v356_v11  ;;  %v370_v27 = vld [vmem:[%s3126_s2 + $0xb8] sm:$0xff] }
  0x33   :  { %1645 = vmatpush1.bf16.msra.mxu1 %v1644_v20  ;;  %1583 = vmatprep.subr.bf16.mxu0 %v1582_v21  ;;  %v359_v20 = vld [vmem:[%s3126_s2 + $0x60] sm:$0xff]  ;;  %v357_v21 = vld [vmem:[%s3126_s2 + $0x50] sm:$0xff]  ;;  %v42_v28 = vld [vmem:[%s3124_s0 + $0x18] sm:$0xff] }
  0x34   :  { %1647 = vmatprep.subr.bf16.mxu1 %v1646_v25  ;;  %v368_v25 = vld [vmem:[%s3126_s2 + $0xa8] sm:$0xff] }
  0x36   :  { %1585 = vmatpush1.bf16.msra.mxu0 %v1584_v31 }
  0x37   :  { %1649 = vmatpush1.bf16.msra.mxu1 %v1648_v32  ;;  %1587 = vmatprep.subr.bf16.mxu0 %v1586_v33 }
  0x38   :  { %1651 = vmatprep.subr.bf16.mxu1 %v1650_v37 }
  0x3a   :  { %1589 = vmatpush1.bf16.msra.mxu0 %v1588_v43 }
  0x3b   :  { %1653 = vmatpush1.bf16.msra.mxu1 %v1652_v44  ;;  %1591 = vmatprep.subr.bf16.mxu0 %v1590_v45 }
  0x3c   :  { %1655 = vmatprep.subr.bf16.mxu1 %v1654_v49 }
  0x3e   :  { %1593 = vmatpush1.bf16.msra.mxu0 %v1592_v55 }
  0x3f   :  { %1657 = vmatpush1.bf16.msra.mxu1 %v1656_v56  ;;  %1595 = vmatprep.subr.bf16.mxu0 %v1594_v57 }
  0x40   :  { %1659 = vmatprep.subr.bf16.mxu1 %v1658_v61 }
  0x42   :  { %1597 = vmatpush1.bf16.msra.mxu0 %v1596_v3 }
  0x43   :  { %1661 = vmatpush1.bf16.msra.mxu1 %v1660_v4  ;;  %1663 = vmatprep.subr.bf16.mxu0 %v2473_v5 }
  0x44   :  { %1695 = vmatprep.subr.bf16.mxu1 %v2484_v9 }
  0x45   :  { %258 = vmatmul.mubr.f32.vlgmr.msra.gmra.mrb[0].mxu0 %v39_v15 }
  0x46   :  { %16 = vsyncpa [#allocation4], 0  ;;  %335 = vmatmul.mubr.f32.vlgmr.msra.gmra.mrb[0].mxu1 %v39_v15  ;;  %1665 = vmatpush1.bf16.msra.mxu0 %v2504_v16  ;;  %v2542_v29 = vpack.c.bf16 %v359_v20, %v355_v17  ;;  %v41_v30 = vld [vmem:[%s3124_s0 + $0x10] sm:$0xff]  ;;  %v2549_v31 = vpack.c.bf16 %v361_v22, %v357_v21  ;;  %v2551_v32 = vpack.c.bf16 %v368_v25, %v364_v24  ;;  %v363_v33 = vld [vmem:[%s3126_s2 + $0x80] sm:$0xff]  ;;  %v2009_v52 = vmov 0.0   ;;  %s2010_s23 = smov 64  }
  0x47   :  { %1697 = vmatpush1.bf16.msra.mxu1 %v2510_v18  ;;  %1667 = vmatprep.subr.bf16.mxu0 %v2512_v19  ;;  %v367_v34 = vld [vmem:[%s3126_s2 + $0xa0] sm:$0xff]  ;;  %v365_v35 = vld [vmem:[%s3126_s2 + $0x90] sm:$0xff]  ;;  %v2563_v36 = vpack.c.bf16 %v370_v27, %v366_v26  ;;  %v372_v38 = vld [vmem:[%s3126_s2 + $0xc8] sm:$0xff]  ;;  %vm815_vm0 = vcmask 523271   ;;  %vm629_vm1 = vcmask 523264   ;;  %vm2012_vm2 = vmmov 0  }
  0x48   :  { %1699 = vmatprep.subr.bf16.mxu1 %v2524_v23  ;;  %v369_v37 = vld [vmem:[%s3126_s2 + $0xb0] sm:$0xff]  ;;  %v376_v39 = vld [vmem:[%s3126_s2 + $0xe8] sm:$0xff]  ;;  %263 = vmatprep.mubr.f32.mxu0 %v42_v28  ;;  %v374_v40 = vld [vmem:[%s3126_s2 + $0xd8] sm:$0xff]  ;;  %v2581_v42 = vpack.c.bf16 %v367_v34, %v363_v33  ;;  %vm1385_vm3 = vcmask 261120   ;;  %s2013_s26 = smov [#allocation3]   ;;  %vm1459_vm4 = vcmask 50176  }
  0x49   :  { %v378_v41 = vld [vmem:[%s3126_s2 + $0xf8] sm:$0xff]  ;;  %340 = vmatprep.mubr.f32.mxu1 %v42_v28  ;;  %264 = vmatmul.mubr.f32.gmra.mrb[2].mxu0 %v41_v30  ;;  %v2585_v43 = vpack.c.bf16 %v369_v37, %v365_v35  ;;  %v2587_v44 = vpack.c.bf16 %v376_v39, %v372_v38  ;;  %v371_v45 = vld [vmem:[%s3126_s2 + $0xc0] sm:$0xff]  ;;  %v373_v47 = vld [vmem:[%s3126_s2 + $0xd0] sm:$0xff]  ;;  %s1467_s27 = sshll.u32 %s2013_s26, 4  ;;  %s1468_s27 = int_to_ptr.vmem [resolvable:$true] %s1467_s27 }
  0x4a   :  { %1669 = vmatpush1.bf16.msra.mxu0 %v2542_v29  ;;  %341 = vmatmul.mubr.f32.gmra.mrb[2].mxu1 %v41_v30  ;;  %v375_v46 = vld [vmem:[%s3126_s2 + $0xe0] sm:$0xff]  ;;  %v2599_v48 = vpack.c.bf16 %v378_v41, %v374_v40  ;;  %v377_v49 = vld [vmem:[%s3126_s2 + $0xf0] sm:$0xff]  ;;  %v380_v50 = vld [vmem:[%s3126_s2 + $0x108] sm:$0xff]  ;;  %p1990_p1 = scmp.lt.s32.totalorder %s1468_s27, %s1468_s27 }
  0x4b   :  { %1701 = vmatpush1.bf16.msra.mxu1 %v2549_v31  ;;  %1671 = vmatprep.subr.bf16.mxu0 %v2551_v32  ;;  %v384_v51 = vld [vmem:[%s3126_s2 + $0x128] sm:$0xff]  ;;  %v382_v53 = vld [vmem:[%s3126_s2 + $0x118] sm:$0xff]  ;;  %v2619_v55 = vpack.c.bf16 %v375_v46, %v371_v45  ;;  %v2623_v56 = vpack.c.bf16 %v377_v49, %v373_v47  ;;  %v379_v58 = vld [vmem:[%s3126_s2 + $0x100] sm:$0xff] }
  0x4c   :  { %1703 = vmatprep.subr.bf16.mxu1 %v2563_v36  ;;  %475 = vmatprep.mubr.f32.mxu0 %v2009_v52  ;;  %v386_v54 = vld [vmem:[%s3126_s2 + $0x138] sm:$0xff]  ;;  %v2625_v57 = vpack.c.bf16 %v384_v51, %v380_v50  ;;  %v383_v59 = vld [vmem:[%s3126_s2 + $0x120] sm:$0xff]  ;;  %v381_v60 = vld [vmem:[%s3126_s2 + $0x110] sm:$0xff] }
  0x4d   :  { %546 = vmatprep.mubr.f32.mxu1 %v2009_v52  ;;  %v2637_v61 = vpack.c.bf16 %v386_v54, %v382_v53  ;;  %v385_v62 = vld [vmem:[%s3126_s2 + $0x130] sm:$0xff]  ;;  %v388_v63 = vld [vmem:[%s3126_s2 + $0x148] sm:$0xff]  ;;  %v390_v1 = vld [vmem:[%s3126_s2 + $0x158] sm:$0xff]  ;;  %v2655_v3 = vpack.c.bf16 %v383_v59, %v379_v58 }
  0x4e   :  { %1673 = vmatpush1.bf16.msra.mxu0 %v2581_v42  ;;  %v392_v0 = vld [vmem:[%s3126_s2 + $0x168] sm:$0xff]  ;;  %v394_v2 = vld [vmem:[%s3126_s2 + $0x178] sm:$0xff]  ;;  %v2659_v4 = vpack.c.bf16 %v385_v62, %v381_v60  ;;  %v387_v7 = vld [vmem:[%s3126_s2 + $0x140] sm:$0xff] }
  0x4f   :  { %1705 = vmatpush1.bf16.msra.mxu1 %v2585_v43  ;;  %1675 = vmatprep.subr.bf16.mxu0 %v2587_v44  ;;  %v2661_v6 = vpack.c.bf16 %v392_v0, %v388_v63  ;;  %v391_v8 = vld [vmem:[%s3126_s2 + $0x160] sm:$0xff]  ;;  %v389_v10 = vld [vmem:[%s3126_s2 + $0x150] sm:$0xff]  ;;  %v2673_v11 = vpack.c.bf16 %v394_v2, %v390_v1  ;;  %v396_v13 = vld [vmem:[%s3126_s2 + $0x188] sm:$0xff] }
  0x50   :  { %1707 = vmatprep.subr.bf16.mxu1 %v2599_v48  ;;  %v393_v12 = vld [vmem:[%s3126_s2 + $0x170] sm:$0xff]  ;;  %v400_v14 = vld [vmem:[%s3126_s2 + $0x1a8] sm:$0xff]  ;;  %v398_v15 = vld [vmem:[%s3126_s2 + $0x198] sm:$0xff]  ;;  %v2691_v20 = vpack.c.bf16 %v391_v8, %v387_v7 }
  0x51   :  { %v402_v17 = vld [vmem:[%s3126_s2 + $0x1b8] sm:$0xff]  ;;  %v1716_v21 = vpack.c.bf16 %v393_v12, %v389_v10  ;;  %v2695_v22 = vpack.c.bf16 %v400_v14, %v396_v13  ;;  %v395_v24 = vld [vmem:[%s3126_s2 + $0x180] sm:$0xff]  ;;  %v397_v26 = vld [vmem:[%s3126_s2 + $0x190] sm:$0xff] }
  0x52   :  { %1677 = vmatpush1.bf16.msra.mxu0 %v2619_v55  ;;  %v399_v25 = vld [vmem:[%s3126_s2 + $0x1a0] sm:$0xff]  ;;  %v1718_v27 = vpack.c.bf16 %v402_v17, %v398_v15  ;;  %v401_v28 = vld [vmem:[%s3126_s2 + $0x1b0] sm:$0xff]  ;;  %v404_v30 = vld [vmem:[%s3126_s2 + $0x1c8] sm:$0xff] }
  0x53   :  { %1709 = vmatpush1.bf16.msra.mxu1 %v2623_v56  ;;  %1679 = vmatprep.subr.bf16.mxu0 %v2625_v57  ;;  %v408_v33 = vld [vmem:[%s3126_s2 + $0x1e8] sm:$0xff]  ;;  %v406_v34 = vld [vmem:[%s3126_s2 + $0x1d8] sm:$0xff]  ;;  %v2723_v37 = vpack.c.bf16 %v399_v25, %v395_v24  ;;  %v1720_v38 = vpack.c.bf16 %v401_v28, %v397_v26  ;;  %v403_v40 = vld [vmem:[%s3126_s2 + $0x1c0] sm:$0xff] }
  0x54   :  { %1711 = vmatprep.subr.bf16.mxu1 %v2637_v61  ;;  %v410_v35 = vld [vmem:[%s3126_s2 + $0x1f8] sm:$0xff]  ;;  %v2726_v39 = vpack.c.bf16 %v408_v33, %v404_v30  ;;  %v407_v41 = vld [vmem:[%s3126_s2 + $0x1e0] sm:$0xff]  ;;  %v405_v45 = vld [vmem:[%s3126_s2 + $0x1d0] sm:$0xff] }
  0x55   :  { %v1722_v46 = vpack.c.bf16 %v410_v35, %v406_v34  ;;  %v409_v47 = vld [vmem:[%s3126_s2 + $0x1f0] sm:$0xff]  ;;  %v614_v49 = vld [vmem:[%s3129_s5 + $0x8] sm:$0xff]  ;;  %v616_v50 = vld [vmem:[%s3129_s5 + $0x18] sm:$0xff]  ;;  %v2747_v51 = vpack.c.bf16 %v407_v41, %v403_v40 }
  0x56   :  { %1681 = vmatpush1.bf16.msra.mxu0 %v2655_v3  ;;  %v1724_v53 = vpack.c.bf16 %v409_v47, %v405_v45  ;;  %v1726_v54 = vpack.c.bf16 %v616_v50, %v614_v49  ;;  %v613_v58 = vld [vmem:[%s3129_s5] sm:$0xff]  ;;  %v615_v59 = vld [vmem:[%s3129_s5 + $0x10] sm:$0xff]  ;;  %v626_v1 = vld [vmem:[%s3129_s5 + $0x68] sm:$0xff] }
  0x57   :  { %1713 = vmatpush1.bf16.msra.mxu1 %v2659_v4  ;;  %1683 = vmatprep.subr.bf16.mxu0 %v2661_v6  ;;  %v2757_v60 = vpack.c.bf16 %v615_v59, %v613_v58  ;;  %v621_v62 = vld [vmem:[%s3129_s5 + $0x40] sm:$0xff]  ;;  %v623_v63 = vld [vmem:[%s3129_s5 + $0x50] sm:$0xff]  ;;  %v628_v2 = vld [vmem:[%s3129_s5 + $0x78] sm:$0xff] }
  0x58   :  { %1715 = vmatprep.subr.bf16.mxu1 %v2673_v11  ;;  %v2807_v0 = vpack.c.bf16 %v623_v63, %v621_v62  ;;  %v625_v7 = vld [vmem:[%s3129_s5 + $0x60] sm:$0xff]  ;;  %v627_v8 = vld [vmem:[%s3129_s5 + $0x70] sm:$0xff]  ;;  %v584_v12 = vld [vmem:[%s3128_s4 + $0x18] sm:$0xff] }
  0x59   :  { %v2825_v10 = vpack.c.bf16 %v627_v8, %v625_v7  ;;  %v581_v14 = vld [vmem:[%s3128_s4] sm:$0xff]  ;;  %v583_v15 = vld [vmem:[%s3128_s4 + $0x10] sm:$0xff]  ;;  %v588_v24 = vld [vmem:[%s3128_s4 + $0x38] sm:$0xff] }
  0x5a   :  { %1685 = vmatpush1.bf16.msra.mxu0 %v2691_v20  ;;  %v2843_v17 = vpack.c.bf16 %v583_v15, %v581_v14  ;;  %v585_v26 = vld [vmem:[%s3128_s4 + $0x20] sm:$0xff]  ;;  %v590_v30 = vld [vmem:[%s3128_s4 + $0x48] sm:$0xff]  ;;  %v592_v33 = vld [vmem:[%s3128_s4 + $0x58] sm:$0xff] }
  0x5b   :  { %1717 = vmatpush1.bf16.msra.mxu1 %v1716_v21  ;;  %1687 = vmatprep.subr.bf16.mxu0 %v2695_v22  ;;  %v2873_v34 = vpack.c.bf16 %v592_v33, %v590_v30  ;;  %v589_v35 = vld [vmem:[%s3128_s4 + $0x40] sm:$0xff]  ;;  %v594_v41 = vld [vmem:[%s3128_s4 + $0x68] sm:$0xff]  ;;  %v596_v45 = vld [vmem:[%s3128_s4 + $0x78] sm:$0xff]  ;;  %v173_v30 = vlaneseq }
  0x5c   :  { %1719 = vmatprep.subr.bf16.mxu1 %v1718_v27  ;;  %v593_v47 = vld [vmem:[%s3128_s4 + $0x60] sm:$0xff]  ;;  %v595_v49 = vld [vmem:[%s3128_s4 + $0x70] sm:$0xff]  ;;  %v612_v14 = vld [vmem:[%s3128_s4 + $0xf8] sm:$0xff] }
  0x5d   :  { %v2899_v50 = vpack.c.bf16 %v595_v49, %v593_v47  ;;  %v597_v59 = vld [vmem:[%s3128_s4 + $0x80] sm:$0xff]  ;;  %v603_v62 = vld [vmem:[%s3128_s4 + $0xb0] sm:$0xff]  ;;  %v174_v33 = vshrl.u32 %v173_v30, 7 }
  0x5e   :  { %1689 = vmatpush1.bf16.msra.mxu0 %v2723_v37  ;;  %v605_v7 = vld [vmem:[%s3128_s4 + $0xc0] sm:$0xff] }
  0x5f   :  { %1721 = vmatpush1.bf16.msra.mxu1 %v1720_v38  ;;  %1691 = vmatprep.subr.bf16.mxu0 %v2726_v39 }
  0x60   :  { %1723 = vmatprep.subr.bf16.mxu1 %v1722_v46 }
  0x62   :  { %1693 = vmatpush1.bf16.msra.mxu0 %v2747_v51 }
  0x63   :  { %1725 = vmatpush1.bf16.msra.mxu1 %v1724_v53  ;;  %1727 = vmatprep.subr.bf16.mxu0 %v1726_v54 }
  0x64   :  { %1807 = vmatprep.subr.bf16.mxu1 %v2484_v9  ;;  %v618_v9 = vld [vmem:[%s3129_s5 + $0x28] sm:$0xff] }
  0x65   :  { %476 = vmatmul.mubr.f32.vlgmr.msra.gmra.mrb[0].mxu0 %v2009_v52 }
  0x66   :  { %547 = vmatmul.mubr.f32.vlgmr.msra.gmra.mrb[0].mxu1 %v2009_v52  ;;  %1729 = vmatpush1.bf16.msra.mxu0 %v2757_v60 }
  0x67   :  { %697 = vmatprep.mubr.f32.mxu0 %v2009_v52  ;;  %1809 = vmatpush1.bf16.msra.mxu1 %v2510_v18  ;;  %v620_v18 = vld [vmem:[%s3129_s5 + $0x38] sm:$0xff] }
  0x68   :  { %1811 = vmatprep.subr.bf16.mxu1 %v2524_v23  ;;  %1016 = vmatprep.mubr.f32.mxu1 %v2009_v52  ;;  %v2781_v23 = vpack.c.bf16 %v620_v18, %v618_v9  ;;  %v599_v9 = vld [vmem:[%s3128_s4 + $0x90] sm:$0xff] }
  0x69   :  { %v2917_v18 = vpack.c.bf16 %v599_v9, %v597_v59 }
  0x6a   :  { %1731 = vmatprep.subr.bf16.mxu0 %v2781_v23 }
  0x6b   :  { %1813 = vmatpush1.bf16.msra.mxu1 %v2549_v31  ;;  %v617_v31 = vld [vmem:[%s3129_s5 + $0x20] sm:$0xff] }
  0x6c   :  { %1815 = vmatprep.subr.bf16.mxu1 %v2563_v36  ;;  %v619_v36 = vld [vmem:[%s3129_s5 + $0x30] sm:$0xff] }
  0x6f   :  { %1817 = vmatpush1.bf16.msra.mxu1 %v2585_v43  ;;  %v2789_v43 = vpack.c.bf16 %v619_v36, %v617_v31  ;;  %v602_v31 = vld [vmem:[%s3128_s4 + $0xa8] sm:$0xff]  ;;  %v604_v36 = vld [vmem:[%s3128_s4 + $0xb8] sm:$0xff] }
  0x70   :  { %1819 = vmatprep.subr.bf16.mxu1 %v2599_v48  ;;  %v622_v48 = vld [vmem:[%s3129_s5 + $0x48] sm:$0xff] }
  0x71   :  { %1733 = vmatpush1.bf16.msra.mxu0 %v2789_v43 }
  0x73   :  { %1821 = vmatpush1.bf16.msra.mxu1 %v2623_v56  ;;  %v624_v56 = vld [vmem:[%s3129_s5 + $0x58] sm:$0xff] }
  0x74   :  { %1823 = vmatprep.subr.bf16.mxu1 %v2637_v61  ;;  %v2799_v61 = vpack.c.bf16 %v624_v56, %v622_v48  ;;  %v2927_v48 = vpack.c.bf16 %v604_v36, %v602_v31  ;;  %v601_v56 = vld [vmem:[%s3128_s4 + $0xa0] sm:$0xff] }
  0x75   :  { %v2935_v63 = vpack.c.bf16 %v603_v62, %v601_v56 }
  0x76   :  { %1735 = vmatprep.subr.bf16.mxu0 %v2799_v61 }
  0x77   :  { %1825 = vmatpush1.bf16.msra.mxu1 %v2659_v4  ;;  %1737 = vmatpush1.bf16.msra.mxu0 %v2807_v0  ;;  %v2817_v4 = vpack.c.bf16 %v628_v2, %v626_v1  ;;  %v606_v1 = vld [vmem:[%s3128_s4 + $0xc8] sm:$0xff]  ;;  %v608_v2 = vld [vmem:[%s3128_s4 + $0xd8] sm:$0xff] }
  0x78   :  { %1827 = vmatprep.subr.bf16.mxu1 %v2673_v11  ;;  %v582_v11 = vld [vmem:[%s3128_s4 + $0x8] sm:$0xff]  ;;  %v2947_v8 = vpack.c.bf16 %v608_v2, %v606_v1  ;;  %v183_v1 = vsub.s32 2, %v174_v33 }
  0x79   :  { %1739 = vmatprep.subr.bf16.mxu0 %v2817_v4  ;;  %v2835_v13 = vpack.c.bf16 %v584_v12, %v582_v11  ;;  %v607_v11 = vld [vmem:[%s3128_s4 + $0xd0] sm:$0xff]  ;;  %v610_v12 = vld [vmem:[%s3128_s4 + $0xe8] sm:$0xff] }
  0x7a   :  { %v2959_v15 = vpack.c.bf16 %v607_v11, %v605_v7 }
  0x7b   :  { %1829 = vmatpush1.bf16.msra.mxu1 %v1716_v21  ;;  %1741 = vmatpush1.bf16.msra.mxu0 %v2825_v10  ;;  %v586_v21 = vld [vmem:[%s3128_s4 + $0x28] sm:$0xff] }
  0x7c   :  { %1831 = vmatprep.subr.bf16.mxu1 %v1718_v27  ;;  %1743 = vmatprep.subr.bf16.mxu0 %v2835_v13  ;;  %v2855_v25 = vpack.c.bf16 %v588_v24, %v586_v21  ;;  %v587_v27 = vld [vmem:[%s3128_s4 + $0x30] sm:$0xff]  ;;  %v2962_v21 = vpack.c.bf16 %v612_v14, %v610_v12  ;;  %v609_v24 = vld [vmem:[%s3128_s4 + $0xe0] sm:$0xff] }
  0x7d   :  { %v2863_v28 = vpack.c.bf16 %v587_v27, %v585_v26  ;;  %v611_v26 = vld [vmem:[%s3128_s4 + $0xf0] sm:$0xff] }
  0x7e   :  { %698 = vmatmul.mubr.f32.vlgmr.msra.gmra.mrb[4].mxu0 %v2009_v52  ;;  %v2971_v27 = vpack.c.bf16 %v611_v26, %v609_v24 }
  0x7f   :  { %1833 = vmatpush1.bf16.msra.mxu1 %v1720_v38  ;;  %1745 = vmatpush1.bf16.msra.mxu0 %v2843_v17  ;;  %v591_v38 = vld [vmem:[%s3128_s4 + $0x50] sm:$0xff] }
  0x80   :  { %1835 = vmatprep.subr.bf16.mxu1 %v1722_v46  ;;  %768 = vmatprep.mubr.f32.mxu0 %v2009_v52  ;;  %v2881_v40 = vpack.c.bf16 %v591_v38, %v589_v35  ;;  %v2891_v46 = vpack.c.bf16 %v596_v45, %v594_v41  ;;  %v2976_v35 = vsub.s32 0, %v174_v33  ;;  %v171_v38 = vld [vmem:[%s3127_s3] sm:$0xf]  ;;  %v2981_v41 = vsub.s32 1, %v174_v33 }
  0x81   :  { %1747 = vmatprep.subr.bf16.mxu0 %v2855_v25  ;;  %v2994_v7 = vrot.slane %v171_v38, %v183_v1 }
  0x82   :  { %v2984_v45 = vrot.slane %v171_v38, %v2976_v35  ;;  %v2987_v47 = vrot.slane %v171_v38, %v2981_v41 }
  0x83   :  { %1837 = vmatpush1.bf16.msra.mxu1 %v1724_v53  ;;  %1749 = vmatpush1.bf16.msra.mxu0 %v2863_v28  ;;  %v598_v53 = vld [vmem:[%s3128_s4 + $0x88] sm:$0xff] }
  0x84   :  { %1839 = vmatprep.subr.bf16.mxu1 %v1726_v54  ;;  %1751 = vmatprep.subr.bf16.mxu0 %v2873_v34  ;;  %v600_v54 = vld [vmem:[%s3128_s4 + $0x98] sm:$0xff] }
  0x85   :  { %v2909_v58 = vpack.c.bf16 %v600_v54, %v598_v53  ;;  %v187_v53 = vsub.s32 3, %v174_v33 }
  0x87   :  { %1753 = vmatpush1.bf16.msra.mxu0 %v2881_v40  ;;  %v2991_v62 = vrot.slane %v171_v38, %v187_v53 }
  0x88   :  { %1755 = vmatprep.subr.bf16.mxu0 %v2891_v46 }
  0x8b   :  { %1757 = vmatpush1.bf16.msra.mxu0 %v2899_v50 }
  0x8c   :  { %1759 = vmatprep.subr.bf16.mxu0 %v2909_v58 }
  0x8f   :  { %1761 = vmatpush1.bf16.msra.mxu0 %v2917_v18 }
  0x90   :  { %1763 = vmatprep.subr.bf16.mxu0 %v2927_v48 }
  0x93   :  { %1765 = vmatpush1.bf16.msra.mxu0 %v2935_v63 }
  0x94   :  { %1767 = vmatprep.subr.bf16.mxu0 %v2947_v8 }
  0x97   :  { %1769 = vmatpush1.bf16.msra.mxu0 %v2959_v15 }
  0x98   :  { %1771 = vmatprep.subr.bf16.mxu0 %v2962_v21 }
  0x9b   :  { %1773 = vmatpush1.bf16.msra.mxu0 %v2971_v27 }
  0x9c   :  { %1775 = vmatprep.subr.bf16.mxu0 %v2473_v5 }
 0x138   :  { %v477_v49 = vpop.f32.mrb[0].mxu0 }
 0x139   :  { %v1904_v5 = vadd.f32 %v477_v49, %v2984_v45  ;;  %v548_v54 = vpop.f32.mrb[0].mxu1  ;;  %v479_v59 = vpop.f32.mrb[1].mxu0 }
 0x13a   :  { %v1905_v9 = vadd.f32 %v479_v59, %v2987_v47  ;;  %v550_v31 = vpop.f32.mrb[1].mxu1  ;;  %v1908_v12 = vadd.f32 %v548_v54, %v2994_v7 }
 0x13b   :  { %v1475_v36 = vmul.f32 -1.442695, %v1904_v5  ;;  %v1909_v2 = vadd.f32 %v550_v31, %v2991_v62 }
 0x13c   :  { %v1476_v56 = vmul.f32 -1.442695, %v1905_v9 }
 0x13d   :  { %1929 = vpow2.f32 %v1475_v36  ;;  %v1477_v11 = vmul.f32 -1.442695, %v1909_v2 }
 0x13e   :  { %1931 = vpow2.f32 %v1476_v56 }
 0x13f   :  { %1933 = vpow2.f32 %v1477_v11 }
 0x140   :  { %1935 = vtanh.f32 %v1908_v12 }
 0x147   :  { %v1930_v14 = vpop.eup %1929 }
 0x148   :  { %v1932_v24 = vpop.eup %1931  ;;  %v560_v26 = vadd.f32 1.0, %v1930_v14 }
 0x149   :  { %v566_v30 = vadd.f32 1.0, %v1932_v24  ;;  %v1934_v49 = vpop.eup %1933 }
 0x14a   :  { %1937 = vrcp.f32 %v560_v26  ;;  %v1936_v53 = vpop.eup %1935  ;;  %v573_v9 = vadd.f32 1.0, %v1934_v49 }
 0x14b   :  { %1939 = vrcp.f32 %v566_v30 }
 0x14c   :  { %1941 = vrcp.f32 %v573_v9 }
 0x154   :  { %v1938_v5 = vpop.eup %1937 }
 0x155   :  { %v1940_v33 = vpop.eup %1939  ;;  %v577_v59 = vmul.f32 %v1938_v5, %v1936_v53 }
 0x156   :  { %v576_v31 = vmul.f32 0.0, %v1940_v33  ;;  %v1942_v54 = vpop.eup %1941 }
 0x158   :  { %v2997_v38 = vadd.f32 %v577_v59, %v576_v31 }
 0x15a   :  { %1943 = vtanh.f32 %v2997_v38 }
 0x164   :  { %v1944_v36 = vpop.eup %1943 }
 0x165   :  { %v580_v56 = vmul.f32 %v1944_v36, %v1942_v54 }
 0x167   :  { %769 = vmatmul.mubr.f32.vlgmr.msra.gmra.mrb[4].mxu0 %v580_v56  ;;  %1017 = vmatmul.mubr.f32.vlgmr.msra.gmra.mrb[2].mxu1 %v580_v56 }
 0x168   :  { %1777 = vmatpush1.bf16.msra.mxu0 %v2504_v16  ;;  %945 = vmatprep.mubr.f32.mxu0 %v2009_v52  ;;  %v775_v16 = vld [vmem:[%s3130_s6] sm:$0x3] }
 0x169   :  { %1779 = vmatprep.subr.bf16.mxu0 %v2512_v19  ;;  %1841 = vmatpush1.bf16.msra.mxu1 %v2757_v60  ;;  %v780_v19 = vrot.slane %v775_v16, %v2976_v35 }
 0x16a   :  { %1843 = vmatprep.subr.bf16.mxu1 %v2781_v23  ;;  %1165 = vmatprep.mubr.f32.mxu1 %v2009_v52 }
 0x16c   :  { %1781 = vmatpush1.bf16.msra.mxu0 %v2542_v29 }
 0x16d   :  { %1783 = vmatprep.subr.bf16.mxu0 %v2551_v32  ;;  %1845 = vmatpush1.bf16.msra.mxu1 %v2789_v43 }
 0x16e   :  { %1847 = vmatprep.subr.bf16.mxu1 %v2799_v61 }
 0x170   :  { %1785 = vmatpush1.bf16.msra.mxu0 %v2581_v42 }
 0x171   :  { %1787 = vmatprep.subr.bf16.mxu0 %v2587_v44  ;;  %1849 = vmatpush1.bf16.msra.mxu1 %v2807_v0 }
 0x172   :  { %1851 = vmatprep.subr.bf16.mxu1 %v2817_v4 }
 0x174   :  { %1789 = vmatpush1.bf16.msra.mxu0 %v2619_v55 }
 0x175   :  { %1791 = vmatprep.subr.bf16.mxu0 %v2625_v57  ;;  %1853 = vmatpush1.bf16.msra.mxu1 %v2825_v10 }
 0x176   :  { %1855 = vmatprep.subr.bf16.mxu1 %v2835_v13 }
 0x178   :  { %1793 = vmatpush1.bf16.msra.mxu0 %v2655_v3  ;;  %v784_v3 = vrot.slane %v775_v16, %v2981_v41 }
 0x179   :  { %1795 = vmatprep.subr.bf16.mxu0 %v2661_v6 }
 0x17c   :  { %1797 = vmatpush1.bf16.msra.mxu0 %v2691_v20 }
 0x17d   :  { %1799 = vmatprep.subr.bf16.mxu0 %v2695_v22 }
 0x180   :  { %1801 = vmatpush1.bf16.msra.mxu0 %v2723_v37 }
 0x181   :  { %1803 = vmatprep.subr.bf16.mxu0 %v2726_v39 }
 0x184   :  { %1805 = vmatpush1.bf16.msra.mxu0 %v2747_v51 }
 0x187   :  { %946 = vmatmul.mubr.f32.vlgmr.msra.gmra.mrb[2].mxu0 %v580_v56 }
 0x188   :  { %1520 = vmatprep.mubr.msk.f32.mxu0 %vm2012_vm2, %v2009_v52 }
 0x23a   :  { %v770_v29 = vpop.f32.mrb[4].mxu0  ;;  %v1018_v32 = vpop.f32.mrb[2].mxu1 }
 0x23b   :  { %v787_v42 = vadd.f32 %v780_v19, %v770_v29  ;;  %v772_v44 = vpop.f32.mrb[5].mxu0  ;;  %v1020_v55 = vpop.f32.mrb[3].mxu1  ;;  %v1910_v1 = vadd.f32 %v1018_v32, %v2994_v7 }
 0x23c   :  { %v788_v6 = vadd.f32 %v784_v3, %v772_v44  ;;  %v1911_v10 = vadd.f32 %v1020_v55, %v2991_v62 }
 0x23d   :  { %v1478_v57 = vmul.f32 -1.442695, %v787_v42  ;;  %v1288_v42 = vld [vmem:[%s3131_s7 + $0x18] sm:$0xff] }
 0x23e   :  { %v1482_v13 = vmul.f32 -1.442695, %v1911_v10  ;;  %v1479_v59 = vmul.f32 -1.442695, %v788_v6 }
 0x23f   :  { %1945 = vpow2.f32 %v1478_v57 }
 0x240   :  { %1947 = vtanh.f32 %v788_v6 }
 0x249   :  { %v1946_v20 = vpop.eup %1945 }
 0x24a   :  { %v792_v22 = vadd.f32 1.0, %v1946_v20  ;;  %v1948_v37 = vpop.eup %1947 }
 0x24c   :  { %1949 = vrcp.f32 %v792_v22 }
 0x256   :  { %v1950_v39 = vpop.eup %1949 }
 0x257   :  { %v803_v51 = vmul.f32 %v1950_v39, %v1948_v37  ;;  %v802_v54 = vmul.f32 0.0, %v1950_v39  ;;  %v1289_v37 = vld [vmem:[%s3131_s7 + $0x20] sm:$0xff]  ;;  %v1290_v39 = vld [vmem:[%s3131_s7 + $0x28] sm:$0xff] }
 0x259   :  { %805 = vrot.lane.b32.xlu0 %v803_v51, %s2010_s23  ;;  %v1893_v51 = vpack.c.bf16 %v1290_v39, %v1289_v37 }
 0x25a   :  { %v947_v60 = vpop.f32.mrb[2].mxu0 }
 0x25b   :  { %v1906_v23 = vadd.f32 %v947_v60, %v2984_v45  ;;  %v949_v43 = vpop.f32.mrb[3].mxu0  ;;  %v1291_v60 = vld [vmem:[%s3131_s7 + $0x30] sm:$0xff] }
 0x25c   :  { %v1907_v61 = vadd.f32 %v949_v43, %v2987_v47 }
 0x25d   :  { %v1480_v0 = vmul.f32 -1.442695, %v1906_v23  ;;  %v1292_v23 = vld [vmem:[%s3131_s7 + $0x38] sm:$0xff] }
 0x25e   :  { %v1481_v4 = vmul.f32 -1.442695, %v1907_v61  ;;  %v1896_v43 = vpack.c.bf16 %v1292_v23, %v1291_v60  ;;  %v1374_v61 = vld [vmem:[%s3133_s9] sm:$0xff] }
 0x25f   :  { %1951 = vpow2.f32 %v1480_v0  ;;  %v1375_v0 = vld [vmem:[%s3133_s9 + $0x8] sm:$0xff] }
 0x260   :  { %1953 = vpow2.f32 %v1481_v4  ;;  %v1899_v10 = vpack.c.bf16 %v1375_v0, %v1374_v61 }
 0x261   :  { %1955 = vpow2.f32 %v1482_v13 }
 0x262   :  { %1957 = vtanh.f32 %v1910_v1 }
 0x269   :  { %v1952_v2 = vpop.eup %1951 }
 0x26a   :  { %v1954_v11 = vpop.eup %1953  ;;  %v1030_v12 = vadd.f32 1.0, %v1952_v2 }
 0x26b   :  { %v1036_v14 = vadd.f32 1.0, %v1954_v11  ;;  %v1956_v45 = vpop.eup %1955  ;;  %v1376_v11 = vld [vmem:[%s3133_s9 + $0x10] sm:$0xff] }
 0x26c   :  { %1959 = vrcp.f32 %v1030_v12  ;;  %v1958_v24 = vpop.eup %1957  ;;  %v1043_v30 = vadd.f32 1.0, %v1956_v45  ;;  %v1377_v12 = vld [vmem:[%s3133_s9 + $0x18] sm:$0xff]  ;;  %v1486_v45 = vld [vmem:[%s3132_s8] ss:$0 sm:$0xff]  ;;  %s1985_s9 = scalar_lea.vmem %s1468_s27, 32 }
 0x26d   :  { %1961 = vrcp.f32 %v1036_v14  ;;  %v1902_v14 = vpack.c.bf16 %v1377_v12, %v1376_v11  ;;  %p1986_p0 = scmp.ne.s32.totalorder %s1468_s27, %s1985_s9  ;;  %p1991_p2 = scmp.lt.s32.totalorder %s1985_s9, %s1985_s9 }
 0x26e   :  { %1963 = vrcp.f32 %v1043_v30 }
 0x26f   :  { %p1992_p3 = por %p1991_p2, %p1990_p1 }
 0x271   :  { %p1993_p4 = pnand %p1992_p3, %p1986_p0 }
 0x276   :  { %v1960_v47 = vpop.eup %1959 }
 0x277   :  { %v1962_v26 = vpop.eup %1961  ;;  %v1047_v49 = vmul.f32 %v1960_v47, %v1958_v24 }
 0x278   :  { %v1046_v53 = vmul.f32 %v1962_v26, %v2997_v38  ;;  %v1964_v7 = vpop.eup %1963 }
 0x27a   :  { %v1048_v62 = vadd.f32 %v1047_v49, %v1046_v53  ;;  %v1488_v49 = vld [vmem:[%s3134_s10] ss:$0 sm:$0xff] }
 0x27c   :  { %1965 = vtanh.f32 %v1048_v62 }
 0x27d   :  { %1967 = vpow2.f32 %v1479_v59 }
 0x286   :  { %v1966_v5 = vpop.eup %1965 }
 0x287   :  { %v1050_v33 = vmul.f32 %v1966_v5, %v1964_v7  ;;  %v1968_v9 = vpop.eup %1967 }
 0x288   :  { %v799_v31 = vadd.f32 1.0, %v1968_v9 }
 0x28a   :  { %1969 = vrcp.f32 %v799_v31 }
 0x294   :  { %v1970_v16 = vpop.eup %1969 }
 0x2cb   :  { %v806_v36 = vpop.permute.xlu0 %805 }
 0x2cc   :  { %v3036_v56 = vadd.f32 %v806_v36, %v802_v54 }
 0x2ce   :  { %1971 = vtanh.f32 %v3036_v56 }
 0x2d8   :  { %v1972_v19 = vpop.eup %1971 }
 0x2d9   :  { %v810_v38 = vmul.f32 %v1972_v19, %v1970_v16 }
 0x2db   :  { %812 = vrot.lane.b32.xlu0 %v810_v38, %s2010_s23 }
 0x34d   :  { %v813_v29 = vpop.permute.xlu0 %812 }
 0x34e   :  { %816 = vst.msk [vmem:[#allocation2 - $0x7] sm:$0x80] %vm815_vm0, %v813_v29  ;;  %1483 = vmatmul.mubr.msk.f32.vlgmr.msra.gmra.mrb[4].mxu1 %vm629_vm1, %v813_v29 }
 0x34f   :  { %1857 = vmatpush1.bf16.msra.mxu1 %v2843_v17  ;;  %1236 = vmatprep.mubr.f32.mxu1 %v2009_v52  ;;  %v1243_v17 = vld [vmem:[%s3130_s6] sm:$0x3] }
 0x350   :  { %1859 = vmatprep.subr.bf16.mxu1 %v2855_v25  ;;  %v1248_v25 = vrot.slane %v1243_v17, %v2976_v35  ;;  %v1287_v35 = vld [vmem:[%s3131_s7 + $0x10] sm:$0xff] }
 0x351   :  { %v1890_v44 = vpack.c.bf16 %v1288_v42, %v1287_v35 }
 0x353   :  { %1861 = vmatpush1.bf16.msra.mxu1 %v2863_v28 }
 0x354   :  { %1863 = vmatprep.subr.bf16.mxu1 %v2873_v34 }
 0x357   :  { %1865 = vmatpush1.bf16.msra.mxu1 %v2881_v40 }
 0x358   :  { %1867 = vmatprep.subr.bf16.mxu1 %v2891_v46 }
 0x35b   :  { %1869 = vmatpush1.bf16.msra.mxu1 %v2899_v50  ;;  %v1252_v50 = vrot.slane %v1243_v17, %v2981_v41  ;;  %v2011_v41 = vmov 0.0|0.0  }
 0x35c   :  { %1871 = vmatprep.subr.bf16.mxu1 %v2909_v58  ;;  %1886 = vmatprep.subr.bf16.mxu0 %v2011_v41 }
 0x35f   :  { %1873 = vmatpush1.bf16.msra.mxu1 %v2917_v18 }
 0x360   :  { %1875 = vmatprep.subr.bf16.mxu1 %v2927_v48 }
 0x363   :  { %1877 = vmatpush1.bf16.msra.mxu1 %v2935_v63 }
 0x364   :  { %1879 = vmatprep.subr.bf16.mxu1 %v2947_v8 }
 0x367   :  { %1881 = vmatpush1.bf16.msra.mxu1 %v2959_v15 }
 0x368   :  { %1883 = vmatprep.subr.bf16.mxu1 %v2962_v21  ;;  %v1285_v21 = vld [vmem:[%s3131_s7] sm:$0xff] }
 0x36b   :  { %1885 = vmatpush1.bf16.msra.mxu1 %v2971_v27  ;;  %v1286_v27 = vld [vmem:[%s3131_s7 + $0x8] sm:$0xff] }
 0x36c   :  { %v1887_v32 = vpack.c.bf16 %v1286_v27, %v1285_v21  ;;  %1898 = vmatprep.subr.bf16.mxu1 %v2011_v41 }
 0x36e   :  { %1237 = vmatmul.mubr.f32.vlgmr.msra.gmra.mrb[4].mxu1 %v1050_v33  ;;  %1888 = vmatpush3.bf16.msra.mxu0 %v1887_v32 }
 0x36f   :  { %1889 = vmatprep.subr.bf16.mxu0 %v2011_v41  ;;  %1531 = vmatprep.mubr.msk.f32.mxu1 %vm2012_vm2, %v2009_v52 }
 0x370   :  { %1900 = vmatpush3.bf16.msra.mxu1 %v1899_v10 }
 0x371   :  { %1901 = vmatprep.subr.bf16.mxu1 %v2011_v41 }
 0x372   :  { %1891 = vmatpush3.bf16.msra.mxu0 %v1890_v44 }
 0x373   :  { %1892 = vmatprep.subr.bf16.mxu0 %v2011_v41 }
 0x374   :  { %1903 = vmatpush3.bf16.msra.mxu1 %v1902_v14 }
 0x376   :  { %1894 = vmatpush3.bf16.msra.mxu0 %v1893_v51 }
 0x377   :  { %1895 = vmatprep.subr.bf16.mxu0 %v2011_v41 }
 0x37a   :  { %1897 = vmatpush3.bf16.msra.mxu0 %v1896_v43 }
 0x441   :  { %v1238_v28 = vpop.f32.mrb[4].mxu1 }
 0x442   :  { %v1255_v34 = vadd.f32 %v1248_v25, %v1238_v28  ;;  %v1240_v40 = vpop.f32.mrb[5].mxu1 }
 0x443   :  { %v1256_v58 = vadd.f32 %v1252_v50, %v1240_v40 }
 0x444   :  { %v1484_v46 = vmul.f32 -1.442695, %v1255_v34 }
 0x445   :  { %v1485_v55 = vmul.f32 -1.442695, %v1256_v58 }
 0x446   :  { %1973 = vpow2.f32 %v1484_v46 }
 0x447   :  { %1975 = vtanh.f32 %v1256_v58 }
 0x450   :  { %v1974_v18 = vpop.eup %1973 }
 0x451   :  { %v1260_v48 = vadd.f32 1.0, %v1974_v18  ;;  %v1976_v63 = vpop.eup %1975 }
 0x453   :  { %1977 = vrcp.f32 %v1260_v48 }
 0x454   :  { %1979 = vpow2.f32 %v1485_v55 }
 0x45d   :  { %v1978_v8 = vpop.eup %1977 }
 0x45e   :  { %v1271_v15 = vmul.f32 %v1978_v8, %v1976_v63  ;;  %v1980_v57 = vpop.eup %1979  ;;  %v1270_v6 = vmul.f32 %v1978_v8, %v3036_v56 }
 0x45f   :  { %v1267_v3 = vadd.f32 1.0, %v1980_v57 }
 0x460   :  { %1273 = vrot.lane.b32.xlu1 %v1271_v15, %s2010_s23 }
 0x461   :  { %1981 = vrcp.f32 %v1267_v3 }
 0x46b   :  { %v1982_v4 = vpop.eup %1981 }
 0x4d2   :  { %v1274_v20 = vpop.permute.xlu1 %1273 }
 0x4d3   :  { %v1276_v22 = vadd.f32 %v1274_v20, %v1270_v6 }
 0x4d5   :  { %1983 = vtanh.f32 %v1276_v22 }
 0x4df   :  { %v1984_v13 = vpop.eup %1983 }
 0x4e0   :  { %v1278_v1 = vmul.f32 %v1984_v13, %v1982_v4 }
 0x4e2   :  { %1280 = vrot.lane.b32.xlu1 %v1278_v1, %s2010_s23 }
 0x554   :  { %v1281_v2 = vpop.permute.xlu1 %1280 }
 0x555   :  { %1283 = vst.msk [vmem:[#allocation2 - $0x6] sm:$0x80] %vm815_vm0, %v1281_v2 }
 0x55c   :  { %v1284_v52 = vld [vmem:[#allocation2] sm:$0x3] }
 0x55d   :  { %1521 = vmatmul.mubr.msk.f32.vlgmr.msra.gmra.mrb[6].mxu0 %vm629_vm1, %v1284_v52 }
 0x630   :  { %v1369_v24 = vpop.f32.mrb[6].mxu0 }
 0x631   :  { %v1370_v47 = vadd.f32 %v1486_v45, %v1369_v24  ;;  %v1522_v26 = vpop.f32.mrb[7].mxu0 }
 0x633   :  { %v1373_v30 = vmax.f32 %v1370_v47, 0.0 }
 0x635   :  { %1532 = vmatmul.mubr.msk.f32.vlgmr.msra.gmra.mrb[6].mxu1 %vm1385_vm3, %v1373_v30 }
 0x708   :  { %v1455_v53 = vpop.f32.mrb[6].mxu1 }
 0x709   :  { %v1456_v62 = vadd.f32 %v1488_v49, %v1455_v53  ;;  %v1533_v7 = vpop.f32.mrb[7].mxu1 }
 0x70b   :  { %1460 = vst.msk [vmem:[#allocation3] sm:$0x3] %vm1459_vm4, %v1456_v62 }
 0x70c   :  { %1996 = shalt.err (!%p1993_p4)
}
 0x70d   :  { %s1997_s29 = scalar_lea.hbm %s3135_s11, 32 }
 0x70e   :  { %p1998_p5 = scmp.ne.s32.totalorder %s3135_s11, %s1997_s29  ;;  %p2001_p6 = scmp.lt.u32.totalorder %s1997_s29, %s3135_s11 }
 0x710   :  { %p2003_p7 = pnand %p2001_p6, %p1998_p5 }
 0x712   :  { %2006 = shalt.err (!%p2003_p7)
}
 0x713   :  { %1470 = dma.vmem_to_hbm [thread:$0]  %s1468_s27, 32, %s3135_s11, [#allocation4]  }
 0x714   :  { %2007 = dma.done.wait [#allocation4], 32  }
 0x715   :  { %2008 = vsyncadd [#allocation4], 4294967264 }
 0x716   :  { %1474 = vsyncpa [#allocation4], 1 }

</bundles_post_ra>
